<compile_context>
chip_gen: v5e
topology: v5e:2x2
jax: 0.10.0
libtpu: 0.0.40
codegen_flags: <defaults>
</compile_context>

<pallas_src>
import math

import jax
import jax.numpy as jnp
from jax import lax
from jax.experimental import pallas as pl
from jax.experimental.pallas import tpu as pltpu  # noqa: F401  (TPU backend)

# ----------------------------- config -------------------------------------
D_MODEL = 32
N_HEADS = 2
D_HEAD = D_MODEL // N_HEADS
D_FF = 64
N_LAYERS = 2
EPS = 1e-6          # harsheet LayerNormalization eps
MASK_NEG = -1e9     # matches masked_fill(mask == 0, -1e9)

# 128-lane-aligned column slots inside the packed per-layer weight slab.
_SLOT = 128
_S_QKV_SA, _S_QKV_CA, _S_WO_SA, _S_WO_CA, _S_W1, _S_W2T = range(6)
_W_COLS = 6 * _SLOT


# --------------------------- fused Pallas kernel ---------------------------
def _decoder_kernel(x_ref, enc_ref, tbias_ref, sbias_ref, w_ref, v_ref, o_ref):
    """Single grid step: the whole decoder forward (all layers + final LN)."""
    F32, BF16 = jnp.float32, jnp.bfloat16
    D = D_MODEL

    x = x_ref[...].astype(F32)            # (R_T, D)   R_T = B * S_tgt
    enc = enc_ref[...].astype(F32)        # (R_S, D)   R_S = B * S_src
    tgt_bias = tbias_ref[...]             # (R_T, R_T) additive: 0 / -1e9
    src_bias = sbias_ref[...]             # (R_T, R_S)

    def layer_norm(v, g, b):
        mu = jnp.mean(v, axis=-1, keepdims=True)
        var = jnp.mean(jnp.square(v - mu), axis=-1, keepdims=True)
        return (v - mu) * lax.rsqrt(var + EPS) * g + b

    def mm(a, w):                         # bf16 MXU operands, f32 accumulate
        return jnp.dot(a.astype(BF16), w, preferred_element_type=F32)

    def mm_tr(a, w_t):                    # a @ w_t.T, transpose folded by MXU
        return lax.dot_general(a.astype(BF16), w_t.astype(BF16),
                               (((1,), (1,)), ((), ())),
                               preferred_element_type=F32)

    def wslot(l, slot, width):            # 128-lane-aligned weight slot load
        return w_ref[l, :, slot * _SLOT: slot * _SLOT + width]

    def attend(q, k, v, bias, wo, bo):
        # q:(Sq,D)  k,v:(Sk,D) f32; bias:(Sq,Sk) additive; wo:(D,D) bf16 with
        # rows grouped by head; bo:(1,D).  Softmax scale folded into W_q/b_q.
        out = None
        for h in range(N_HEADS):
            lo, hi = h * D_HEAD, (h + 1) * D_HEAD
            s = mm_tr(q[:, lo:hi], k[:, lo:hi]) + bias        # (Sq, Sk)
            s = s - jnp.max(s, axis=-1, keepdims=True)
            p = jnp.exp(s)
            p = p * pl.reciprocal(jnp.sum(p, axis=-1, keepdims=True),
                                  approx=True)
            ph = mm(p, v[:, lo:hi].astype(BF16))              # (Sq, D_HEAD)
            contrib = mm(ph, wo[lo:hi, :])                    # (Sq, D)
            out = contrib if out is None else out + contrib   # "concat" via sum
        return out + bo

    # Layers unrolled statically; every slab index below is a Python constant.
    for l in range(N_LAYERS):
        g_row = v_ref[l, 4:5, :]          # [ln1_g | ln2_g | ln3_g]   (1, 3D)
        b_row = v_ref[l, 5:6, :]          # [ln1_b | ln2_b | ln3_b]

        # ---- sublayer 1: masked self-attention (pre-norm residual) ----
        xn = layer_norm(x, g_row[:, 0:D], b_row[:, 0:D])
        qkv = mm(xn, wslot(l, _S_QKV_SA, 3 * D)) + v_ref[l, 0:1, :]   # (R_T,3D)
        x = x + attend(qkv[:, 0:D], qkv[:, D:2 * D], qkv[:, 2 * D:3 * D],
                       tgt_bias, wslot(l, _S_WO_SA, D), v_ref[l, 2:3, 0:D])

        # ---- sublayer 2: cross-attention over the encoder output ----
        xn = layer_norm(x, g_row[:, D:2 * D], b_row[:, D:2 * D])
        wqkv_ca = wslot(l, _S_QKV_CA, 3 * D)
        bqkv_ca = v_ref[l, 1:2, :]
        q = mm(xn, wqkv_ca[:, 0:D]) + bqkv_ca[:, 0:D]
        kv = mm(enc, wqkv_ca[:, D:3 * D]) + bqkv_ca[:, D:3 * D]       # (R_S,2D)
        x = x + attend(q, kv[:, 0:D], kv[:, D:2 * D],
                       src_bias, wslot(l, _S_WO_CA, D),
                       v_ref[l, 2:3, D:2 * D])

        # ---- sublayer 3: position-wise feed-forward ----
        xn = layer_norm(x, g_row[:, 2 * D:3 * D], b_row[:, 2 * D:3 * D])
        h = jnp.maximum(mm(xn, wslot(l, _S_W1, D_FF)) + v_ref[l, 3:4, 0:D_FF],
                        0.0)
        x = x + (mm_tr(h, wslot(l, _S_W2T, D_FF)) + v_ref[l, 2:3, 2 * D:3 * D])

    # final LayerNorm
    o_ref[...] = layer_norm(x, v_ref[N_LAYERS, 0:1, 0:D],
                            v_ref[N_LAYERS, 0:1, D:2 * D]).astype(o_ref.dtype)


# ------------------------------- wrapper -----------------------------------
def _block_diag_bias(mask, batch, sq, sk):
    """Additive attention bias (0 = attend, -1e9 = masked) for the batch-folded
    layout: block-diagonal over batches, module's 0/1 mask inside each block."""
    m = jnp.broadcast_to(mask, (batch, 1, sq, sk)).reshape(batch, sq, sk)
    m = m.astype(jnp.float32)
    eye = jnp.eye(batch, dtype=jnp.float32)
    keep = (m[:, :, None, :] * eye[:, None, :, None]).reshape(batch * sq,
                                                              batch * sk)
    return jnp.where(keep > 0.0, 0.0, MASK_NEG).astype(jnp.float32)


@jax.jit
def decoder_forward(packed, x, encoder_output, src_mask, tgt_mask):
    B, S_T, D = x.shape
    S_S = encoder_output.shape[1]

    x2 = x.reshape(B * S_T, D)
    enc2 = encoder_output.reshape(B * S_S, D)
    tgt_bias = _block_diag_bias(tgt_mask, B, S_T, S_T)
    src_bias = _block_diag_bias(src_mask, B, S_T, S_S)

    # Single grid step (grid=()): whole-array blocks, every weight DMA'd once,
    # no per-step pipeline prologue.  Total resident footprint < 200 KiB, far
    # below any generation's VMEM, so no vmem_limit / tiling overrides needed.
    out = pl.pallas_call(
        _decoder_kernel,
        out_shape=jax.ShapeDtypeStruct((B * S_T, D), x.dtype),
    )(x2, enc2, tgt_bias, src_bias, packed["w"], packed["v"])

    return out.reshape(B, S_T, D)


# ------------------------- deterministic init ------------------------------
def _init_mha(key):
    ks = jax.random.split(key, 4)
    s = 1.0 / math.sqrt(D_MODEL)
    return {
        "wq": jax.random.normal(ks[0], (D_MODEL, D_MODEL), jnp.float32) * s,
        "bq": jnp.zeros((D_MODEL,), jnp.float32),
        "wk": jax.random.normal(ks[1], (D_MODEL, D_MODEL), jnp.float32) * s,
        "bk": jnp.zeros((D_MODEL,), jnp.float32),
        "wv": jax.random.normal(ks[2], (D_MODEL, D_MODEL), jnp.float32) * s,
        "bv": jnp.zeros((D_MODEL,), jnp.float32),
        "wo": jax.random.normal(ks[3], (D_MODEL, D_MODEL), jnp.float32) * s,
        "bo": jnp.zeros((D_MODEL,), jnp.float32),
    }


def init_params(key):
    layers = []
    for _ in range(N_LAYERS):
        key, k_sa, k_ca, k_w1, k_w2 = jax.random.split(key, 5)
        layers.append({
            "self_attn": _init_mha(k_sa),
            "cross_attn": _init_mha(k_ca),
            "w1": jax.random.normal(k_w1, (D_MODEL, D_FF), jnp.float32)
                  / math.sqrt(D_MODEL),
            "b1": jnp.zeros((D_FF,), jnp.float32),
            "w2": jax.random.normal(k_w2, (D_FF, D_MODEL), jnp.float32)
                  / math.sqrt(D_FF),
            "b2": jnp.zeros((D_MODEL,), jnp.float32),
            "ln1_g": jnp.ones((D_MODEL,), jnp.float32),
            "ln1_b": jnp.zeros((D_MODEL,), jnp.float32),
            "ln2_g": jnp.ones((D_MODEL,), jnp.float32),
            "ln2_b": jnp.zeros((D_MODEL,), jnp.float32),
            "ln3_g": jnp.ones((D_MODEL,), jnp.float32),
            "ln3_b": jnp.zeros((D_MODEL,), jnp.float32),
        })
    return {
        "layers": layers,
        "norm_g": jnp.ones((D_MODEL,), jnp.float32),   # final LayerNorm
        "norm_b": jnp.zeros((D_MODEL,), jnp.float32),
    }


def pack_params(params):
    """Pack everything into two slabs:
       * 'w': (N_LAYERS, D, 6*128) bf16 — one 128-lane-aligned slot per matrix
              [Wqkv_sa | Wqkv_ca | Wo_sa | Wo_ca | W1 | W2^T]; 1/sqrt(d_k)
              softmax scale folded into the Wq columns.
       * 'v': (N_LAYERS+1, 6, 3*D) f32 — biases + LayerNorm vectors; the last
              slot's row 0 holds the final LayerNorm [gamma | beta | 0]."""
    D = D_MODEL
    scale = 1.0 / math.sqrt(D_HEAD)

    def slot(mat):
        return jnp.pad(mat, ((0, 0), (0, _SLOT - mat.shape[1])))

    w_layers, v_layers = [], []
    for lp in params["layers"]:
        sa, ca = lp["self_attn"], lp["cross_attn"]
        w_layers.append(jnp.concatenate([
            slot(jnp.concatenate([sa["wq"] * scale, sa["wk"], sa["wv"]], 1)),
            slot(jnp.concatenate([ca["wq"] * scale, ca["wk"], ca["wv"]], 1)),
            slot(sa["wo"]),
            slot(ca["wo"]),
            slot(lp["w1"]),
            slot(lp["w2"].T),                    # stored transposed
        ], axis=1))

        zero_d = jnp.zeros((D,), jnp.float32)
        v_layers.append(jnp.stack([
            jnp.concatenate([sa["bq"] * scale, sa["bk"], sa["bv"]]),
            jnp.concatenate([ca["bq"] * scale, ca["bk"], ca["bv"]]),
            jnp.concatenate([sa["bo"], ca["bo"], lp["b2"]]),
            jnp.concatenate([lp["b1"], zero_d]),
            jnp.concatenate([lp["ln1_g"], lp["ln2_g"], lp["ln3_g"]]),
            jnp.concatenate([lp["ln1_b"], lp["ln2_b"], lp["ln3_b"]]),
        ]))

    fin = jnp.zeros((6, 3 * D), jnp.float32)
    fin = fin.at[0, 0:D].set(params["norm_g"]).at[0, D:2 * D].set(params["norm_b"])
    v_layers.append(fin)

    return {
        "w": jnp.stack(w_layers).astype(jnp.bfloat16),   # (L, D, 768)
        "v": jnp.stack(v_layers).astype(jnp.float32),    # (L+1, 6, 96)
    }


# --------------------------------- main -------------------------------------
if __name__ == "__main__":
    B, S_TGT, S_SRC = 2, 8, 8

    key = jax.random.PRNGKey(0)
    kx, kenc, kp = jax.random.split(key, 3)

    x = jax.random.normal(kx, (B, S_TGT, D_MODEL), jnp.float32)
    encoder_output = jax.random.normal(kenc, (B, S_SRC, D_MODEL), jnp.float32)

    # masks: 1 = attend, 0 = masked (matches `masked_fill(mask == 0, -1e9)`)
    src_mask = jnp.ones((B, 1, 1, S_SRC), jnp.float32)
    tgt_mask = jnp.tril(jnp.ones((S_TGT, S_TGT), jnp.float32))[None, None, :, :]

    packed = pack_params(init_params(kp))

    out = decoder_forward(packed, x, encoder_output, src_mask, tgt_mask)
    out = jax.block_until_ready(out)
    assert out.shape == (B, S_TGT, D_MODEL)
    print("KERNEL_OK")
</pallas_src>

<mosaic_0001>
module attributes {stable_mosaic.version = 11 : i64} {
  func.func @_decoder_kernel(%arg0: memref<16x32xf32, #tpu.memory_space<vmem>>, %arg1: memref<16x32xf32, #tpu.memory_space<vmem>>, %arg2: memref<16x16xf32, #tpu.memory_space<vmem>>, %arg3: memref<16x16xf32, #tpu.memory_space<vmem>>, %arg4: memref<2x32x768xbf16, #tpu.memory_space<vmem>>, %arg5: memref<3x6x96xf32, #tpu.memory_space<vmem>>, %arg6: memref<16x32xf32, #tpu.memory_space<vmem>>) attributes {dimension_semantics = [], scalar_prefetch = 0 : i64, scratch_operands = 0 : i64, tpu.core_type = #tpu.core_type<tc>} {
    %c0 = arith.constant 0 : index
    %c0_0 = arith.constant 0 : index
    %0 = vector.load %arg0[%c0, %c0_0] : memref<16x32xf32, #tpu.memory_space<vmem>>, vector<16x32xf32>
    %c0_1 = arith.constant 0 : index
    %c0_2 = arith.constant 0 : index
    %1 = vector.load %arg1[%c0_1, %c0_2] : memref<16x32xf32, #tpu.memory_space<vmem>>, vector<16x32xf32>
    %c0_3 = arith.constant 0 : index
    %c0_4 = arith.constant 0 : index
    %2 = vector.load %arg2[%c0_3, %c0_4] : memref<16x16xf32, #tpu.memory_space<vmem>>, vector<16x16xf32>
    %c0_5 = arith.constant 0 : index
    %c0_6 = arith.constant 0 : index
    %3 = vector.load %arg3[%c0_5, %c0_6] : memref<16x16xf32, #tpu.memory_space<vmem>>, vector<16x16xf32>
    %c0_7 = arith.constant 0 : index
    %c4 = arith.constant 4 : index
    %c0_8 = arith.constant 0 : index
    %4 = vector.load %arg5[%c0_7, %c4, %c0_8] : memref<3x6x96xf32, #tpu.memory_space<vmem>>, vector<1x1x96xf32>
    %5 = vector.shape_cast %4 : vector<1x1x96xf32> to vector<1x96xf32>
    %c0_9 = arith.constant 0 : index
    %c5 = arith.constant 5 : index
    %c0_10 = arith.constant 0 : index
    %6 = vector.load %arg5[%c0_9, %c5, %c0_10] : memref<3x6x96xf32, #tpu.memory_space<vmem>>, vector<1x1x96xf32>
    %7 = vector.shape_cast %6 : vector<1x1x96xf32> to vector<1x96xf32>
    %8 = vector.extract_strided_slice %5 {offsets = [0, 0], sizes = [1, 32], strides = [1, 1]} : vector<1x96xf32> to vector<1x32xf32>
    %9 = vector.extract_strided_slice %7 {offsets = [0, 0], sizes = [1, 32], strides = [1, 1]} : vector<1x96xf32> to vector<1x32xf32>
    %cst = arith.constant dense<0.000000e+00> : vector<16xf32>
    %10 = vector.multi_reduction <add>, %0, %cst [1] : vector<16x32xf32> to vector<16xf32>
    %11 = vector.shape_cast %10 : vector<16xf32> to vector<16x1xf32>
    %cst_11 = arith.constant 3.200000e+01 : f32
    %12 = vector.broadcast %cst_11 : f32 to vector<16x1xf32>
    %13 = arith.divf %11, %12 : vector<16x1xf32>
    %14 = vector.broadcast %13 : vector<16x1xf32> to vector<16x32xf32>
    %15 = arith.subf %0, %14 : vector<16x32xf32>
    %16 = arith.mulf %15, %15 : vector<16x32xf32>
    %cst_12 = arith.constant dense<0.000000e+00> : vector<16xf32>
    %17 = vector.multi_reduction <add>, %16, %cst_12 [1] : vector<16x32xf32> to vector<16xf32>
    %18 = vector.shape_cast %17 : vector<16xf32> to vector<16x1xf32>
    %cst_13 = arith.constant 3.200000e+01 : f32
    %19 = vector.broadcast %cst_13 : f32 to vector<16x1xf32>
    %20 = arith.divf %18, %19 : vector<16x1xf32>
    %21 = vector.broadcast %13 : vector<16x1xf32> to vector<16x32xf32>
    %22 = arith.subf %0, %21 : vector<16x32xf32>
    %cst_14 = arith.constant 9.99999997E-7 : f32
    %23 = vector.broadcast %cst_14 : f32 to vector<16x1xf32>
    %24 = arith.addf %20, %23 : vector<16x1xf32>
    %25 = math.rsqrt %24 : vector<16x1xf32>
    %26 = vector.broadcast %25 : vector<16x1xf32> to vector<16x32xf32>
    %27 = arith.mulf %22, %26 : vector<16x32xf32>
    %28 = vector.broadcast %8 : vector<1x32xf32> to vector<16x32xf32>
    %29 = arith.mulf %27, %28 : vector<16x32xf32>
    %30 = vector.broadcast %9 : vector<1x32xf32> to vector<16x32xf32>
    %31 = arith.addf %29, %30 : vector<16x32xf32>
    %c0_15 = arith.constant 0 : index
    %c0_16 = arith.constant 0 : index
    %c0_17 = arith.constant 0 : index
    %32 = vector.load %arg4[%c0_15, %c0_16, %c0_17] : memref<2x32x768xbf16, #tpu.memory_space<vmem>>, vector<1x32x96xbf16>
    %33 = vector.shape_cast %32 : vector<1x32x96xbf16> to vector<32x96xbf16>
    %34 = arith.truncf %31 : vector<16x32xf32> to vector<16x32xbf16>
    %cst_18 = arith.constant dense<0.000000e+00> : vector<16x96xf32>
    %35 = tpu.matmul %34, %33, %cst_18 {dimension_numbers = #tpu.dot_dimension_numbers<[1], [0], [0], [1], [0, 0, 1, 1], [], []>} : vector<16x32xbf16>, vector<32x96xbf16>, vector<16x96xf32> -> vector<16x96xf32>
    %c0_19 = arith.constant 0 : index
    %c0_20 = arith.constant 0 : index
    %c0_21 = arith.constant 0 : index
    %36 = vector.load %arg5[%c0_19, %c0_20, %c0_21] : memref<3x6x96xf32, #tpu.memory_space<vmem>>, vector<1x1x96xf32>
    %37 = vector.shape_cast %36 : vector<1x1x96xf32> to vector<1x96xf32>
    %38 = vector.broadcast %37 : vector<1x96xf32> to vector<16x96xf32>
    %39 = arith.addf %35, %38 : vector<16x96xf32>
    %40 = vector.extract_strided_slice %39 {offsets = [0, 0], sizes = [16, 32], strides = [1, 1]} : vector<16x96xf32> to vector<16x32xf32>
    %41 = vector.extract_strided_slice %39 {offsets = [0, 32], sizes = [16, 32], strides = [1, 1]} : vector<16x96xf32> to vector<16x32xf32>
    %42 = vector.extract_strided_slice %39 {offsets = [0, 64], sizes = [16, 32], strides = [1, 1]} : vector<16x96xf32> to vector<16x32xf32>
    %c0_22 = arith.constant 0 : index
    %c0_23 = arith.constant 0 : index
    %c256 = arith.constant 256 : index
    %43 = vector.load %arg4[%c0_22, %c0_23, %c256] : memref<2x32x768xbf16, #tpu.memory_space<vmem>>, vector<1x32x32xbf16>
    %44 = vector.shape_cast %43 : vector<1x32x32xbf16> to vector<32x32xbf16>
    %c0_24 = arith.constant 0 : index
    %c2 = arith.constant 2 : index
    %c0_25 = arith.constant 0 : index
    %45 = vector.load %arg5[%c0_24, %c2, %c0_25] : memref<3x6x96xf32, #tpu.memory_space<vmem>>, vector<1x1x32xf32>
    %46 = vector.shape_cast %45 : vector<1x1x32xf32> to vector<1x32xf32>
    %47 = vector.extract_strided_slice %40 {offsets = [0, 0], sizes = [16, 16], strides = [1, 1]} : vector<16x32xf32> to vector<16x16xf32>
    %48 = vector.extract_strided_slice %41 {offsets = [0, 0], sizes = [16, 16], strides = [1, 1]} : vector<16x32xf32> to vector<16x16xf32>
    %49 = arith.truncf %47 : vector<16x16xf32> to vector<16x16xbf16>
    %50 = arith.truncf %48 : vector<16x16xf32> to vector<16x16xbf16>
    %cst_26 = arith.constant dense<0.000000e+00> : vector<16x16xf32>
    %51 = tpu.matmul %49, %50, %cst_26 {dimension_numbers = #tpu.dot_dimension_numbers<[1], [1], [0], [0], [0, 0, 1, 0], [], []>} : vector<16x16xbf16>, vector<16x16xbf16>, vector<16x16xf32> -> vector<16x16xf32>
    %52 = arith.addf %51, %2 : vector<16x16xf32>
    %cst_27 = arith.constant dense<0xFF800000> : vector<16xf32>
    %53 = vector.multi_reduction <maximumf>, %52, %cst_27 [1] : vector<16x16xf32> to vector<16xf32>
    %54 = vector.shape_cast %53 : vector<16xf32> to vector<16x1xf32>
    %55 = vector.broadcast %54 : vector<16x1xf32> to vector<16x16xf32>
    %56 = arith.subf %52, %55 : vector<16x16xf32>
    %57 = math.exp %56 : vector<16x16xf32>
    %cst_28 = arith.constant dense<0.000000e+00> : vector<16xf32>
    %58 = vector.multi_reduction <add>, %57, %cst_28 [1] : vector<16x16xf32> to vector<16xf32>
    %59 = vector.shape_cast %58 : vector<16xf32> to vector<16x1xf32>
    %60 = tpu.reciprocal %59 {approx = true} : vector<16x1xf32> -> vector<16x1xf32>
    %61 = vector.broadcast %60 : vector<16x1xf32> to vector<16x16xf32>
    %62 = arith.mulf %57, %61 : vector<16x16xf32>
    %63 = vector.extract_strided_slice %42 {offsets = [0, 0], sizes = [16, 16], strides = [1, 1]} : vector<16x32xf32> to vector<16x16xf32>
    %64 = arith.truncf %63 : vector<16x16xf32> to vector<16x16xbf16>
    %65 = arith.truncf %62 : vector<16x16xf32> to vector<16x16xbf16>
    %cst_29 = arith.constant dense<0.000000e+00> : vector<16x16xf32>
    %66 = tpu.matmul %65, %64, %cst_29 {dimension_numbers = #tpu.dot_dimension_numbers<[1], [0], [0], [1], [0, 0, 1, 1], [], []>} : vector<16x16xbf16>, vector<16x16xbf16>, vector<16x16xf32> -> vector<16x16xf32>
    %67 = vector.extract_strided_slice %44 {offsets = [0, 0], sizes = [16, 32], strides = [1, 1]} : vector<32x32xbf16> to vector<16x32xbf16>
    %68 = arith.truncf %66 : vector<16x16xf32> to vector<16x16xbf16>
    %cst_30 = arith.constant dense<0.000000e+00> : vector<16x32xf32>
    %69 = tpu.matmul %68, %67, %cst_30 {dimension_numbers = #tpu.dot_dimension_numbers<[1], [0], [0], [1], [0, 0, 1, 1], [], []>} : vector<16x16xbf16>, vector<16x32xbf16>, vector<16x32xf32> -> vector<16x32xf32>
    %70 = vector.extract_strided_slice %40 {offsets = [0, 16], sizes = [16, 16], strides = [1, 1]} : vector<16x32xf32> to vector<16x16xf32>
    %71 = vector.extract_strided_slice %41 {offsets = [0, 16], sizes = [16, 16], strides = [1, 1]} : vector<16x32xf32> to vector<16x16xf32>
    %72 = arith.truncf %70 : vector<16x16xf32> to vector<16x16xbf16>
    %73 = arith.truncf %71 : vector<16x16xf32> to vector<16x16xbf16>
    %cst_31 = arith.constant dense<0.000000e+00> : vector<16x16xf32>
    %74 = tpu.matmul %72, %73, %cst_31 {dimension_numbers = #tpu.dot_dimension_numbers<[1], [1], [0], [0], [0, 0, 1, 0], [], []>} : vector<16x16xbf16>, vector<16x16xbf16>, vector<16x16xf32> -> vector<16x16xf32>
    %75 = arith.addf %74, %2 : vector<16x16xf32>
    %cst_32 = arith.constant dense<0xFF800000> : vector<16xf32>
    %76 = vector.multi_reduction <maximumf>, %75, %cst_32 [1] : vector<16x16xf32> to vector<16xf32>
    %77 = vector.shape_cast %76 : vector<16xf32> to vector<16x1xf32>
    %78 = vector.broadcast %77 : vector<16x1xf32> to vector<16x16xf32>
    %79 = arith.subf %75, %78 : vector<16x16xf32>
    %80 = math.exp %79 : vector<16x16xf32>
    %cst_33 = arith.constant dense<0.000000e+00> : vector<16xf32>
    %81 = vector.multi_reduction <add>, %80, %cst_33 [1] : vector<16x16xf32> to vector<16xf32>
    %82 = vector.shape_cast %81 : vector<16xf32> to vector<16x1xf32>
    %83 = tpu.reciprocal %82 {approx = true} : vector<16x1xf32> -> vector<16x1xf32>
    %84 = vector.broadcast %83 : vector<16x1xf32> to vector<16x16xf32>
    %85 = arith.mulf %80, %84 : vector<16x16xf32>
    %86 = vector.extract_strided_slice %42 {offsets = [0, 16], sizes = [16, 16], strides = [1, 1]} : vector<16x32xf32> to vector<16x16xf32>
    %87 = arith.truncf %86 : vector<16x16xf32> to vector<16x16xbf16>
    %88 = arith.truncf %85 : vector<16x16xf32> to vector<16x16xbf16>
    %cst_34 = arith.constant dense<0.000000e+00> : vector<16x16xf32>
    %89 = tpu.matmul %88, %87, %cst_34 {dimension_numbers = #tpu.dot_dimension_numbers<[1], [0], [0], [1], [0, 0, 1, 1], [], []>} : vector<16x16xbf16>, vector<16x16xbf16>, vector<16x16xf32> -> vector<16x16xf32>
    %90 = vector.extract_strided_slice %44 {offsets = [16, 0], sizes = [16, 32], strides = [1, 1]} : vector<32x32xbf16> to vector<16x32xbf16>
    %91 = arith.truncf %89 : vector<16x16xf32> to vector<16x16xbf16>
    %cst_35 = arith.constant dense<0.000000e+00> : vector<16x32xf32>
    %92 = tpu.matmul %91, %90, %cst_35 {dimension_numbers = #tpu.dot_dimension_numbers<[1], [0], [0], [1], [0, 0, 1, 1], [], []>} : vector<16x16xbf16>, vector<16x32xbf16>, vector<16x32xf32> -> vector<16x32xf32>
    %93 = arith.addf %69, %92 : vector<16x32xf32>
    %94 = vector.broadcast %46 : vector<1x32xf32> to vector<16x32xf32>
    %95 = arith.addf %93, %94 : vector<16x32xf32>
    %96 = arith.addf %0, %95 : vector<16x32xf32>
    %97 = vector.extract_strided_slice %5 {offsets = [0, 32], sizes = [1, 32], strides = [1, 1]} : vector<1x96xf32> to vector<1x32xf32>
    %98 = vector.extract_strided_slice %7 {offsets = [0, 32], sizes = [1, 32], strides = [1, 1]} : vector<1x96xf32> to vector<1x32xf32>
    %cst_36 = arith.constant dense<0.000000e+00> : vector<16xf32>
    %99 = vector.multi_reduction <add>, %96, %cst_36 [1] : vector<16x32xf32> to vector<16xf32>
    %100 = vector.shape_cast %99 : vector<16xf32> to vector<16x1xf32>
    %cst_37 = arith.constant 3.200000e+01 : f32
    %101 = vector.broadcast %cst_37 : f32 to vector<16x1xf32>
    %102 = arith.divf %100, %101 : vector<16x1xf32>
    %103 = vector.broadcast %102 : vector<16x1xf32> to vector<16x32xf32>
    %104 = arith.subf %96, %103 : vector<16x32xf32>
    %105 = arith.mulf %104, %104 : vector<16x32xf32>
    %cst_38 = arith.constant dense<0.000000e+00> : vector<16xf32>
    %106 = vector.multi_reduction <add>, %105, %cst_38 [1] : vector<16x32xf32> to vector<16xf32>
    %107 = vector.shape_cast %106 : vector<16xf32> to vector<16x1xf32>
    %cst_39 = arith.constant 3.200000e+01 : f32
    %108 = vector.broadcast %cst_39 : f32 to vector<16x1xf32>
    %109 = arith.divf %107, %108 : vector<16x1xf32>
    %110 = vector.broadcast %102 : vector<16x1xf32> to vector<16x32xf32>
    %111 = arith.subf %96, %110 : vector<16x32xf32>
    %cst_40 = arith.constant 9.99999997E-7 : f32
    %112 = vector.broadcast %cst_40 : f32 to vector<16x1xf32>
    %113 = arith.addf %109, %112 : vector<16x1xf32>
    %114 = math.rsqrt %113 : vector<16x1xf32>
    %115 = vector.broadcast %114 : vector<16x1xf32> to vector<16x32xf32>
    %116 = arith.mulf %111, %115 : vector<16x32xf32>
    %117 = vector.broadcast %97 : vector<1x32xf32> to vector<16x32xf32>
    %118 = arith.mulf %116, %117 : vector<16x32xf32>
    %119 = vector.broadcast %98 : vector<1x32xf32> to vector<16x32xf32>
    %120 = arith.addf %118, %119 : vector<16x32xf32>
    %c0_41 = arith.constant 0 : index
    %c0_42 = arith.constant 0 : index
    %c128 = arith.constant 128 : index
    %121 = vector.load %arg4[%c0_41, %c0_42, %c128] : memref<2x32x768xbf16, #tpu.memory_space<vmem>>, vector<1x32x96xbf16>
    %122 = vector.shape_cast %121 : vector<1x32x96xbf16> to vector<32x96xbf16>
    %c0_43 = arith.constant 0 : index
    %c1 = arith.constant 1 : index
    %c0_44 = arith.constant 0 : index
    %123 = vector.load %arg5[%c0_43, %c1, %c0_44] : memref<3x6x96xf32, #tpu.memory_space<vmem>>, vector<1x1x96xf32>
    %124 = vector.shape_cast %123 : vector<1x1x96xf32> to vector<1x96xf32>
    %125 = vector.extract_strided_slice %122 {offsets = [0, 0], sizes = [32, 32], strides = [1, 1]} : vector<32x96xbf16> to vector<32x32xbf16>
    %126 = arith.truncf %120 : vector<16x32xf32> to vector<16x32xbf16>
    %cst_45 = arith.constant dense<0.000000e+00> : vector<16x32xf32>
    %127 = tpu.matmul %126, %125, %cst_45 {dimension_numbers = #tpu.dot_dimension_numbers<[1], [0], [0], [1], [0, 0, 1, 1], [], []>} : vector<16x32xbf16>, vector<32x32xbf16>, vector<16x32xf32> -> vector<16x32xf32>
    %128 = vector.extract_strided_slice %124 {offsets = [0, 0], sizes = [1, 32], strides = [1, 1]} : vector<1x96xf32> to vector<1x32xf32>
    %129 = vector.broadcast %128 : vector<1x32xf32> to vector<16x32xf32>
    %130 = arith.addf %127, %129 : vector<16x32xf32>
    %131 = vector.extract_strided_slice %122 {offsets = [0, 32], sizes = [32, 64], strides = [1, 1]} : vector<32x96xbf16> to vector<32x64xbf16>
    %132 = arith.truncf %1 : vector<16x32xf32> to vector<16x32xbf16>
    %cst_46 = arith.constant dense<0.000000e+00> : vector<16x64xf32>
    %133 = tpu.matmul %132, %131, %cst_46 {dimension_numbers = #tpu.dot_dimension_numbers<[1], [0], [0], [1], [0, 0, 1, 1], [], []>} : vector<16x32xbf16>, vector<32x64xbf16>, vector<16x64xf32> -> vector<16x64xf32>
    %134 = vector.extract_strided_slice %124 {offsets = [0, 32], sizes = [1, 64], strides = [1, 1]} : vector<1x96xf32> to vector<1x64xf32>
    %135 = vector.broadcast %134 : vector<1x64xf32> to vector<16x64xf32>
    %136 = arith.addf %133, %135 : vector<16x64xf32>
    %137 = vector.extract_strided_slice %136 {offsets = [0, 0], sizes = [16, 32], strides = [1, 1]} : vector<16x64xf32> to vector<16x32xf32>
    %138 = vector.extract_strided_slice %136 {offsets = [0, 32], sizes = [16, 32], strides = [1, 1]} : vector<16x64xf32> to vector<16x32xf32>
    %c0_47 = arith.constant 0 : index
    %c0_48 = arith.constant 0 : index
    %c384 = arith.constant 384 : index
    %139 = vector.load %arg4[%c0_47, %c0_48, %c384] : memref<2x32x768xbf16, #tpu.memory_space<vmem>>, vector<1x32x32xbf16>
    %140 = vector.shape_cast %139 : vector<1x32x32xbf16> to vector<32x32xbf16>
    %c0_49 = arith.constant 0 : index
    %c2_50 = arith.constant 2 : index
    %c32 = arith.constant 32 : index
    %141 = vector.load %arg5[%c0_49, %c2_50, %c32] : memref<3x6x96xf32, #tpu.memory_space<vmem>>, vector<1x1x32xf32>
    %142 = vector.shape_cast %141 : vector<1x1x32xf32> to vector<1x32xf32>
    %143 = vector.extract_strided_slice %130 {offsets = [0, 0], sizes = [16, 16], strides = [1, 1]} : vector<16x32xf32> to vector<16x16xf32>
    %144 = vector.extract_strided_slice %137 {offsets = [0, 0], sizes = [16, 16], strides = [1, 1]} : vector<16x32xf32> to vector<16x16xf32>
    %145 = arith.truncf %143 : vector<16x16xf32> to vector<16x16xbf16>
    %146 = arith.truncf %144 : vector<16x16xf32> to vector<16x16xbf16>
    %cst_51 = arith.constant dense<0.000000e+00> : vector<16x16xf32>
    %147 = tpu.matmul %145, %146, %cst_51 {dimension_numbers = #tpu.dot_dimension_numbers<[1], [1], [0], [0], [0, 0, 1, 0], [], []>} : vector<16x16xbf16>, vector<16x16xbf16>, vector<16x16xf32> -> vector<16x16xf32>
    %148 = arith.addf %147, %3 : vector<16x16xf32>
    %cst_52 = arith.constant dense<0xFF800000> : vector<16xf32>
    %149 = vector.multi_reduction <maximumf>, %148, %cst_52 [1] : vector<16x16xf32> to vector<16xf32>
    %150 = vector.shape_cast %149 : vector<16xf32> to vector<16x1xf32>
    %151 = vector.broadcast %150 : vector<16x1xf32> to vector<16x16xf32>
    %152 = arith.subf %148, %151 : vector<16x16xf32>
    %153 = math.exp %152 : vector<16x16xf32>
    %cst_53 = arith.constant dense<0.000000e+00> : vector<16xf32>
    %154 = vector.multi_reduction <add>, %153, %cst_53 [1] : vector<16x16xf32> to vector<16xf32>
    %155 = vector.shape_cast %154 : vector<16xf32> to vector<16x1xf32>
    %156 = tpu.reciprocal %155 {approx = true} : vector<16x1xf32> -> vector<16x1xf32>
    %157 = vector.broadcast %156 : vector<16x1xf32> to vector<16x16xf32>
    %158 = arith.mulf %153, %157 : vector<16x16xf32>
    %159 = vector.extract_strided_slice %138 {offsets = [0, 0], sizes = [16, 16], strides = [1, 1]} : vector<16x32xf32> to vector<16x16xf32>
    %160 = arith.truncf %159 : vector<16x16xf32> to vector<16x16xbf16>
    %161 = arith.truncf %158 : vector<16x16xf32> to vector<16x16xbf16>
    %cst_54 = arith.constant dense<0.000000e+00> : vector<16x16xf32>
    %162 = tpu.matmul %161, %160, %cst_54 {dimension_numbers = #tpu.dot_dimension_numbers<[1], [0], [0], [1], [0, 0, 1, 1], [], []>} : vector<16x16xbf16>, vector<16x16xbf16>, vector<16x16xf32> -> vector<16x16xf32>
    %163 = vector.extract_strided_slice %140 {offsets = [0, 0], sizes = [16, 32], strides = [1, 1]} : vector<32x32xbf16> to vector<16x32xbf16>
    %164 = arith.truncf %162 : vector<16x16xf32> to vector<16x16xbf16>
    %cst_55 = arith.constant dense<0.000000e+00> : vector<16x32xf32>
    %165 = tpu.matmul %164, %163, %cst_55 {dimension_numbers = #tpu.dot_dimension_numbers<[1], [0], [0], [1], [0, 0, 1, 1], [], []>} : vector<16x16xbf16>, vector<16x32xbf16>, vector<16x32xf32> -> vector<16x32xf32>
    %166 = vector.extract_strided_slice %130 {offsets = [0, 16], sizes = [16, 16], strides = [1, 1]} : vector<16x32xf32> to vector<16x16xf32>
    %167 = vector.extract_strided_slice %137 {offsets = [0, 16], sizes = [16, 16], strides = [1, 1]} : vector<16x32xf32> to vector<16x16xf32>
    %168 = arith.truncf %166 : vector<16x16xf32> to vector<16x16xbf16>
    %169 = arith.truncf %167 : vector<16x16xf32> to vector<16x16xbf16>
    %cst_56 = arith.constant dense<0.000000e+00> : vector<16x16xf32>
    %170 = tpu.matmul %168, %169, %cst_56 {dimension_numbers = #tpu.dot_dimension_numbers<[1], [1], [0], [0], [0, 0, 1, 0], [], []>} : vector<16x16xbf16>, vector<16x16xbf16>, vector<16x16xf32> -> vector<16x16xf32>
    %171 = arith.addf %170, %3 : vector<16x16xf32>
    %cst_57 = arith.constant dense<0xFF800000> : vector<16xf32>
    %172 = vector.multi_reduction <maximumf>, %171, %cst_57 [1] : vector<16x16xf32> to vector<16xf32>
    %173 = vector.shape_cast %172 : vector<16xf32> to vector<16x1xf32>
    %174 = vector.broadcast %173 : vector<16x1xf32> to vector<16x16xf32>
    %175 = arith.subf %171, %174 : vector<16x16xf32>
    %176 = math.exp %175 : vector<16x16xf32>
    %cst_58 = arith.constant dense<0.000000e+00> : vector<16xf32>
    %177 = vector.multi_reduction <add>, %176, %cst_58 [1] : vector<16x16xf32> to vector<16xf32>
    %178 = vector.shape_cast %177 : vector<16xf32> to vector<16x1xf32>
    %179 = tpu.reciprocal %178 {approx = true} : vector<16x1xf32> -> vector<16x1xf32>
    %180 = vector.broadcast %179 : vector<16x1xf32> to vector<16x16xf32>
    %181 = arith.mulf %176, %180 : vector<16x16xf32>
    %182 = vector.extract_strided_slice %138 {offsets = [0, 16], sizes = [16, 16], strides = [1, 1]} : vector<16x32xf32> to vector<16x16xf32>
    %183 = arith.truncf %182 : vector<16x16xf32> to vector<16x16xbf16>
    %184 = arith.truncf %181 : vector<16x16xf32> to vector<16x16xbf16>
    %cst_59 = arith.constant dense<0.000000e+00> : vector<16x16xf32>
    %185 = tpu.matmul %184, %183, %cst_59 {dimension_numbers = #tpu.dot_dimension_numbers<[1], [0], [0], [1], [0, 0, 1, 1], [], []>} : vector<16x16xbf16>, vector<16x16xbf16>, vector<16x16xf32> -> vector<16x16xf32>
    %186 = vector.extract_strided_slice %140 {offsets = [16, 0], sizes = [16, 32], strides = [1, 1]} : vector<32x32xbf16> to vector<16x32xbf16>
    %187 = arith.truncf %185 : vector<16x16xf32> to vector<16x16xbf16>
    %cst_60 = arith.constant dense<0.000000e+00> : vector<16x32xf32>
    %188 = tpu.matmul %187, %186, %cst_60 {dimension_numbers = #tpu.dot_dimension_numbers<[1], [0], [0], [1], [0, 0, 1, 1], [], []>} : vector<16x16xbf16>, vector<16x32xbf16>, vector<16x32xf32> -> vector<16x32xf32>
    %189 = arith.addf %165, %188 : vector<16x32xf32>
    %190 = vector.broadcast %142 : vector<1x32xf32> to vector<16x32xf32>
    %191 = arith.addf %189, %190 : vector<16x32xf32>
    %192 = arith.addf %96, %191 : vector<16x32xf32>
    %193 = vector.extract_strided_slice %5 {offsets = [0, 64], sizes = [1, 32], strides = [1, 1]} : vector<1x96xf32> to vector<1x32xf32>
    %194 = vector.extract_strided_slice %7 {offsets = [0, 64], sizes = [1, 32], strides = [1, 1]} : vector<1x96xf32> to vector<1x32xf32>
    %cst_61 = arith.constant dense<0.000000e+00> : vector<16xf32>
    %195 = vector.multi_reduction <add>, %192, %cst_61 [1] : vector<16x32xf32> to vector<16xf32>
    %196 = vector.shape_cast %195 : vector<16xf32> to vector<16x1xf32>
    %cst_62 = arith.constant 3.200000e+01 : f32
    %197 = vector.broadcast %cst_62 : f32 to vector<16x1xf32>
    %198 = arith.divf %196, %197 : vector<16x1xf32>
    %199 = vector.broadcast %198 : vector<16x1xf32> to vector<16x32xf32>
    %200 = arith.subf %192, %199 : vector<16x32xf32>
    %201 = arith.mulf %200, %200 : vector<16x32xf32>
    %cst_63 = arith.constant dense<0.000000e+00> : vector<16xf32>
    %202 = vector.multi_reduction <add>, %201, %cst_63 [1] : vector<16x32xf32> to vector<16xf32>
    %203 = vector.shape_cast %202 : vector<16xf32> to vector<16x1xf32>
    %cst_64 = arith.constant 3.200000e+01 : f32
    %204 = vector.broadcast %cst_64 : f32 to vector<16x1xf32>
    %205 = arith.divf %203, %204 : vector<16x1xf32>
    %206 = vector.broadcast %198 : vector<16x1xf32> to vector<16x32xf32>
    %207 = arith.subf %192, %206 : vector<16x32xf32>
    %cst_65 = arith.constant 9.99999997E-7 : f32
    %208 = vector.broadcast %cst_65 : f32 to vector<16x1xf32>
    %209 = arith.addf %205, %208 : vector<16x1xf32>
    %210 = math.rsqrt %209 : vector<16x1xf32>
    %211 = vector.broadcast %210 : vector<16x1xf32> to vector<16x32xf32>
    %212 = arith.mulf %207, %211 : vector<16x32xf32>
    %213 = vector.broadcast %193 : vector<1x32xf32> to vector<16x32xf32>
    %214 = arith.mulf %212, %213 : vector<16x32xf32>
    %215 = vector.broadcast %194 : vector<1x32xf32> to vector<16x32xf32>
    %216 = arith.addf %214, %215 : vector<16x32xf32>
    %c0_66 = arith.constant 0 : index
    %c0_67 = arith.constant 0 : index
    %c512 = arith.constant 512 : index
    %217 = vector.load %arg4[%c0_66, %c0_67, %c512] : memref<2x32x768xbf16, #tpu.memory_space<vmem>>, vector<1x32x64xbf16>
    %218 = vector.shape_cast %217 : vector<1x32x64xbf16> to vector<32x64xbf16>
    %219 = arith.truncf %216 : vector<16x32xf32> to vector<16x32xbf16>
    %cst_68 = arith.constant dense<0.000000e+00> : vector<16x64xf32>
    %220 = tpu.matmul %219, %218, %cst_68 {dimension_numbers = #tpu.dot_dimension_numbers<[1], [0], [0], [1], [0, 0, 1, 1], [], []>} : vector<16x32xbf16>, vector<32x64xbf16>, vector<16x64xf32> -> vector<16x64xf32>
    %c0_69 = arith.constant 0 : index
    %c3 = arith.constant 3 : index
    %c0_70 = arith.constant 0 : index
    %221 = vector.load %arg5[%c0_69, %c3, %c0_70] : memref<3x6x96xf32, #tpu.memory_space<vmem>>, vector<1x1x64xf32>
    %222 = vector.shape_cast %221 : vector<1x1x64xf32> to vector<1x64xf32>
    %223 = vector.broadcast %222 : vector<1x64xf32> to vector<16x64xf32>
    %224 = arith.addf %220, %223 : vector<16x64xf32>
    %cst_71 = arith.constant 0.000000e+00 : f32
    %225 = vector.broadcast %cst_71 : f32 to vector<16x64xf32>
    %226 = arith.maximumf %224, %225 : vector<16x64xf32>
    %c0_72 = arith.constant 0 : index
    %c0_73 = arith.constant 0 : index
    %c640 = arith.constant 640 : index
    %227 = vector.load %arg4[%c0_72, %c0_73, %c640] : memref<2x32x768xbf16, #tpu.memory_space<vmem>>, vector<1x32x64xbf16>
    %228 = vector.shape_cast %227 : vector<1x32x64xbf16> to vector<32x64xbf16>
    %229 = arith.truncf %226 : vector<16x64xf32> to vector<16x64xbf16>
    %cst_74 = arith.constant dense<0.000000e+00> : vector<16x32xf32>
    %230 = tpu.matmul %229, %228, %cst_74 {dimension_numbers = #tpu.dot_dimension_numbers<[1], [1], [0], [0], [0, 0, 1, 0], [], []>} : vector<16x64xbf16>, vector<32x64xbf16>, vector<16x32xf32> -> vector<16x32xf32>
    %c0_75 = arith.constant 0 : index
    %c2_76 = arith.constant 2 : index
    %c64 = arith.constant 64 : index
    %231 = vector.load %arg5[%c0_75, %c2_76, %c64] : memref<3x6x96xf32, #tpu.memory_space<vmem>>, vector<1x1x32xf32>
    %232 = vector.shape_cast %231 : vector<1x1x32xf32> to vector<1x32xf32>
    %233 = vector.broadcast %232 : vector<1x32xf32> to vector<16x32xf32>
    %234 = arith.addf %230, %233 : vector<16x32xf32>
    %235 = arith.addf %192, %234 : vector<16x32xf32>
    %c1_77 = arith.constant 1 : index
    %c4_78 = arith.constant 4 : index
    %c0_79 = arith.constant 0 : index
    %236 = vector.load %arg5[%c1_77, %c4_78, %c0_79] : memref<3x6x96xf32, #tpu.memory_space<vmem>>, vector<1x1x96xf32>
    %237 = vector.shape_cast %236 : vector<1x1x96xf32> to vector<1x96xf32>
    %c1_80 = arith.constant 1 : index
    %c5_81 = arith.constant 5 : index
    %c0_82 = arith.constant 0 : index
    %238 = vector.load %arg5[%c1_80, %c5_81, %c0_82] : memref<3x6x96xf32, #tpu.memory_space<vmem>>, vector<1x1x96xf32>
    %239 = vector.shape_cast %238 : vector<1x1x96xf32> to vector<1x96xf32>
    %240 = vector.extract_strided_slice %237 {offsets = [0, 0], sizes = [1, 32], strides = [1, 1]} : vector<1x96xf32> to vector<1x32xf32>
    %241 = vector.extract_strided_slice %239 {offsets = [0, 0], sizes = [1, 32], strides = [1, 1]} : vector<1x96xf32> to vector<1x32xf32>
    %cst_83 = arith.constant dense<0.000000e+00> : vector<16xf32>
    %242 = vector.multi_reduction <add>, %235, %cst_83 [1] : vector<16x32xf32> to vector<16xf32>
    %243 = vector.shape_cast %242 : vector<16xf32> to vector<16x1xf32>
    %cst_84 = arith.constant 3.200000e+01 : f32
    %244 = vector.broadcast %cst_84 : f32 to vector<16x1xf32>
    %245 = arith.divf %243, %244 : vector<16x1xf32>
    %246 = vector.broadcast %245 : vector<16x1xf32> to vector<16x32xf32>
    %247 = arith.subf %235, %246 : vector<16x32xf32>
    %248 = arith.mulf %247, %247 : vector<16x32xf32>
    %cst_85 = arith.constant dense<0.000000e+00> : vector<16xf32>
    %249 = vector.multi_reduction <add>, %248, %cst_85 [1] : vector<16x32xf32> to vector<16xf32>
    %250 = vector.shape_cast %249 : vector<16xf32> to vector<16x1xf32>
    %cst_86 = arith.constant 3.200000e+01 : f32
    %251 = vector.broadcast %cst_86 : f32 to vector<16x1xf32>
    %252 = arith.divf %250, %251 : vector<16x1xf32>
    %253 = vector.broadcast %245 : vector<16x1xf32> to vector<16x32xf32>
    %254 = arith.subf %235, %253 : vector<16x32xf32>
    %cst_87 = arith.constant 9.99999997E-7 : f32
    %255 = vector.broadcast %cst_87 : f32 to vector<16x1xf32>
    %256 = arith.addf %252, %255 : vector<16x1xf32>
    %257 = math.rsqrt %256 : vector<16x1xf32>
    %258 = vector.broadcast %257 : vector<16x1xf32> to vector<16x32xf32>
    %259 = arith.mulf %254, %258 : vector<16x32xf32>
    %260 = vector.broadcast %240 : vector<1x32xf32> to vector<16x32xf32>
    %261 = arith.mulf %259, %260 : vector<16x32xf32>
    %262 = vector.broadcast %241 : vector<1x32xf32> to vector<16x32xf32>
    %263 = arith.addf %261, %262 : vector<16x32xf32>
    %c1_88 = arith.constant 1 : index
    %c0_89 = arith.constant 0 : index
    %c0_90 = arith.constant 0 : index
    %264 = vector.load %arg4[%c1_88, %c0_89, %c0_90] : memref<2x32x768xbf16, #tpu.memory_space<vmem>>, vector<1x32x96xbf16>
    %265 = vector.shape_cast %264 : vector<1x32x96xbf16> to vector<32x96xbf16>
    %266 = arith.truncf %263 : vector<16x32xf32> to vector<16x32xbf16>
    %cst_91 = arith.constant dense<0.000000e+00> : vector<16x96xf32>
    %267 = tpu.matmul %266, %265, %cst_91 {dimension_numbers = #tpu.dot_dimension_numbers<[1], [0], [0], [1], [0, 0, 1, 1], [], []>} : vector<16x32xbf16>, vector<32x96xbf16>, vector<16x96xf32> -> vector<16x96xf32>
    %c1_92 = arith.constant 1 : index
    %c0_93 = arith.constant 0 : index
    %c0_94 = arith.constant 0 : index
    %268 = vector.load %arg5[%c1_92, %c0_93, %c0_94] : memref<3x6x96xf32, #tpu.memory_space<vmem>>, vector<1x1x96xf32>
    %269 = vector.shape_cast %268 : vector<1x1x96xf32> to vector<1x96xf32>
    %270 = vector.broadcast %269 : vector<1x96xf32> to vector<16x96xf32>
    %271 = arith.addf %267, %270 : vector<16x96xf32>
    %272 = vector.extract_strided_slice %271 {offsets = [0, 0], sizes = [16, 32], strides = [1, 1]} : vector<16x96xf32> to vector<16x32xf32>
    %273 = vector.extract_strided_slice %271 {offsets = [0, 32], sizes = [16, 32], strides = [1, 1]} : vector<16x96xf32> to vector<16x32xf32>
    %274 = vector.extract_strided_slice %271 {offsets = [0, 64], sizes = [16, 32], strides = [1, 1]} : vector<16x96xf32> to vector<16x32xf32>
    %c1_95 = arith.constant 1 : index
    %c0_96 = arith.constant 0 : index
    %c256_97 = arith.constant 256 : index
    %275 = vector.load %arg4[%c1_95, %c0_96, %c256_97] : memref<2x32x768xbf16, #tpu.memory_space<vmem>>, vector<1x32x32xbf16>
    %276 = vector.shape_cast %275 : vector<1x32x32xbf16> to vector<32x32xbf16>
    %c1_98 = arith.constant 1 : index
    %c2_99 = arith.constant 2 : index
    %c0_100 = arith.constant 0 : index
    %277 = vector.load %arg5[%c1_98, %c2_99, %c0_100] : memref<3x6x96xf32, #tpu.memory_space<vmem>>, vector<1x1x32xf32>
    %278 = vector.shape_cast %277 : vector<1x1x32xf32> to vector<1x32xf32>
    %279 = vector.extract_strided_slice %272 {offsets = [0, 0], sizes = [16, 16], strides = [1, 1]} : vector<16x32xf32> to vector<16x16xf32>
    %280 = vector.extract_strided_slice %273 {offsets = [0, 0], sizes = [16, 16], strides = [1, 1]} : vector<16x32xf32> to vector<16x16xf32>
    %281 = arith.truncf %279 : vector<16x16xf32> to vector<16x16xbf16>
    %282 = arith.truncf %280 : vector<16x16xf32> to vector<16x16xbf16>
    %cst_101 = arith.constant dense<0.000000e+00> : vector<16x16xf32>
    %283 = tpu.matmul %281, %282, %cst_101 {dimension_numbers = #tpu.dot_dimension_numbers<[1], [1], [0], [0], [0, 0, 1, 0], [], []>} : vector<16x16xbf16>, vector<16x16xbf16>, vector<16x16xf32> -> vector<16x16xf32>
    %284 = arith.addf %283, %2 : vector<16x16xf32>
    %cst_102 = arith.constant dense<0xFF800000> : vector<16xf32>
    %285 = vector.multi_reduction <maximumf>, %284, %cst_102 [1] : vector<16x16xf32> to vector<16xf32>
    %286 = vector.shape_cast %285 : vector<16xf32> to vector<16x1xf32>
    %287 = vector.broadcast %286 : vector<16x1xf32> to vector<16x16xf32>
    %288 = arith.subf %284, %287 : vector<16x16xf32>
    %289 = math.exp %288 : vector<16x16xf32>
    %cst_103 = arith.constant dense<0.000000e+00> : vector<16xf32>
    %290 = vector.multi_reduction <add>, %289, %cst_103 [1] : vector<16x16xf32> to vector<16xf32>
    %291 = vector.shape_cast %290 : vector<16xf32> to vector<16x1xf32>
    %292 = tpu.reciprocal %291 {approx = true} : vector<16x1xf32> -> vector<16x1xf32>
    %293 = vector.broadcast %292 : vector<16x1xf32> to vector<16x16xf32>
    %294 = arith.mulf %289, %293 : vector<16x16xf32>
    %295 = vector.extract_strided_slice %274 {offsets = [0, 0], sizes = [16, 16], strides = [1, 1]} : vector<16x32xf32> to vector<16x16xf32>
    %296 = arith.truncf %295 : vector<16x16xf32> to vector<16x16xbf16>
    %297 = arith.truncf %294 : vector<16x16xf32> to vector<16x16xbf16>
    %cst_104 = arith.constant dense<0.000000e+00> : vector<16x16xf32>
    %298 = tpu.matmul %297, %296, %cst_104 {dimension_numbers = #tpu.dot_dimension_numbers<[1], [0], [0], [1], [0, 0, 1, 1], [], []>} : vector<16x16xbf16>, vector<16x16xbf16>, vector<16x16xf32> -> vector<16x16xf32>
    %299 = vector.extract_strided_slice %276 {offsets = [0, 0], sizes = [16, 32], strides = [1, 1]} : vector<32x32xbf16> to vector<16x32xbf16>
    %300 = arith.truncf %298 : vector<16x16xf32> to vector<16x16xbf16>
    %cst_105 = arith.constant dense<0.000000e+00> : vector<16x32xf32>
    %301 = tpu.matmul %300, %299, %cst_105 {dimension_numbers = #tpu.dot_dimension_numbers<[1], [0], [0], [1], [0, 0, 1, 1], [], []>} : vector<16x16xbf16>, vector<16x32xbf16>, vector<16x32xf32> -> vector<16x32xf32>
    %302 = vector.extract_strided_slice %272 {offsets = [0, 16], sizes = [16, 16], strides = [1, 1]} : vector<16x32xf32> to vector<16x16xf32>
    %303 = vector.extract_strided_slice %273 {offsets = [0, 16], sizes = [16, 16], strides = [1, 1]} : vector<16x32xf32> to vector<16x16xf32>
    %304 = arith.truncf %302 : vector<16x16xf32> to vector<16x16xbf16>
    %305 = arith.truncf %303 : vector<16x16xf32> to vector<16x16xbf16>
    %cst_106 = arith.constant dense<0.000000e+00> : vector<16x16xf32>
    %306 = tpu.matmul %304, %305, %cst_106 {dimension_numbers = #tpu.dot_dimension_numbers<[1], [1], [0], [0], [0, 0, 1, 0], [], []>} : vector<16x16xbf16>, vector<16x16xbf16>, vector<16x16xf32> -> vector<16x16xf32>
    %307 = arith.addf %306, %2 : vector<16x16xf32>
    %cst_107 = arith.constant dense<0xFF800000> : vector<16xf32>
    %308 = vector.multi_reduction <maximumf>, %307, %cst_107 [1] : vector<16x16xf32> to vector<16xf32>
    %309 = vector.shape_cast %308 : vector<16xf32> to vector<16x1xf32>
    %310 = vector.broadcast %309 : vector<16x1xf32> to vector<16x16xf32>
    %311 = arith.subf %307, %310 : vector<16x16xf32>
    %312 = math.exp %311 : vector<16x16xf32>
    %cst_108 = arith.constant dense<0.000000e+00> : vector<16xf32>
    %313 = vector.multi_reduction <add>, %312, %cst_108 [1] : vector<16x16xf32> to vector<16xf32>
    %314 = vector.shape_cast %313 : vector<16xf32> to vector<16x1xf32>
    %315 = tpu.reciprocal %314 {approx = true} : vector<16x1xf32> -> vector<16x1xf32>
    %316 = vector.broadcast %315 : vector<16x1xf32> to vector<16x16xf32>
    %317 = arith.mulf %312, %316 : vector<16x16xf32>
    %318 = vector.extract_strided_slice %274 {offsets = [0, 16], sizes = [16, 16], strides = [1, 1]} : vector<16x32xf32> to vector<16x16xf32>
    %319 = arith.truncf %318 : vector<16x16xf32> to vector<16x16xbf16>
    %320 = arith.truncf %317 : vector<16x16xf32> to vector<16x16xbf16>
    %cst_109 = arith.constant dense<0.000000e+00> : vector<16x16xf32>
    %321 = tpu.matmul %320, %319, %cst_109 {dimension_numbers = #tpu.dot_dimension_numbers<[1], [0], [0], [1], [0, 0, 1, 1], [], []>} : vector<16x16xbf16>, vector<16x16xbf16>, vector<16x16xf32> -> vector<16x16xf32>
    %322 = vector.extract_strided_slice %276 {offsets = [16, 0], sizes = [16, 32], strides = [1, 1]} : vector<32x32xbf16> to vector<16x32xbf16>
    %323 = arith.truncf %321 : vector<16x16xf32> to vector<16x16xbf16>
    %cst_110 = arith.constant dense<0.000000e+00> : vector<16x32xf32>
    %324 = tpu.matmul %323, %322, %cst_110 {dimension_numbers = #tpu.dot_dimension_numbers<[1], [0], [0], [1], [0, 0, 1, 1], [], []>} : vector<16x16xbf16>, vector<16x32xbf16>, vector<16x32xf32> -> vector<16x32xf32>
    %325 = arith.addf %301, %324 : vector<16x32xf32>
    %326 = vector.broadcast %278 : vector<1x32xf32> to vector<16x32xf32>
    %327 = arith.addf %325, %326 : vector<16x32xf32>
    %328 = arith.addf %235, %327 : vector<16x32xf32>
    %329 = vector.extract_strided_slice %237 {offsets = [0, 32], sizes = [1, 32], strides = [1, 1]} : vector<1x96xf32> to vector<1x32xf32>
    %330 = vector.extract_strided_slice %239 {offsets = [0, 32], sizes = [1, 32], strides = [1, 1]} : vector<1x96xf32> to vector<1x32xf32>
    %cst_111 = arith.constant dense<0.000000e+00> : vector<16xf32>
    %331 = vector.multi_reduction <add>, %328, %cst_111 [1] : vector<16x32xf32> to vector<16xf32>
    %332 = vector.shape_cast %331 : vector<16xf32> to vector<16x1xf32>
    %cst_112 = arith.constant 3.200000e+01 : f32
    %333 = vector.broadcast %cst_112 : f32 to vector<16x1xf32>
    %334 = arith.divf %332, %333 : vector<16x1xf32>
    %335 = vector.broadcast %334 : vector<16x1xf32> to vector<16x32xf32>
    %336 = arith.subf %328, %335 : vector<16x32xf32>
    %337 = arith.mulf %336, %336 : vector<16x32xf32>
    %cst_113 = arith.constant dense<0.000000e+00> : vector<16xf32>
    %338 = vector.multi_reduction <add>, %337, %cst_113 [1] : vector<16x32xf32> to vector<16xf32>
    %339 = vector.shape_cast %338 : vector<16xf32> to vector<16x1xf32>
    %cst_114 = arith.constant 3.200000e+01 : f32
    %340 = vector.broadcast %cst_114 : f32 to vector<16x1xf32>
    %341 = arith.divf %339, %340 : vector<16x1xf32>
    %342 = vector.broadcast %334 : vector<16x1xf32> to vector<16x32xf32>
    %343 = arith.subf %328, %342 : vector<16x32xf32>
    %cst_115 = arith.constant 9.99999997E-7 : f32
    %344 = vector.broadcast %cst_115 : f32 to vector<16x1xf32>
    %345 = arith.addf %341, %344 : vector<16x1xf32>
    %346 = math.rsqrt %345 : vector<16x1xf32>
    %347 = vector.broadcast %346 : vector<16x1xf32> to vector<16x32xf32>
    %348 = arith.mulf %343, %347 : vector<16x32xf32>
    %349 = vector.broadcast %329 : vector<1x32xf32> to vector<16x32xf32>
    %350 = arith.mulf %348, %349 : vector<16x32xf32>
    %351 = vector.broadcast %330 : vector<1x32xf32> to vector<16x32xf32>
    %352 = arith.addf %350, %351 : vector<16x32xf32>
    %c1_116 = arith.constant 1 : index
    %c0_117 = arith.constant 0 : index
    %c128_118 = arith.constant 128 : index
    %353 = vector.load %arg4[%c1_116, %c0_117, %c128_118] : memref<2x32x768xbf16, #tpu.memory_space<vmem>>, vector<1x32x96xbf16>
    %354 = vector.shape_cast %353 : vector<1x32x96xbf16> to vector<32x96xbf16>
    %c1_119 = arith.constant 1 : index
    %c1_120 = arith.constant 1 : index
    %c0_121 = arith.constant 0 : index
    %355 = vector.load %arg5[%c1_119, %c1_120, %c0_121] : memref<3x6x96xf32, #tpu.memory_space<vmem>>, vector<1x1x96xf32>
    %356 = vector.shape_cast %355 : vector<1x1x96xf32> to vector<1x96xf32>
    %357 = vector.extract_strided_slice %354 {offsets = [0, 0], sizes = [32, 32], strides = [1, 1]} : vector<32x96xbf16> to vector<32x32xbf16>
    %358 = arith.truncf %352 : vector<16x32xf32> to vector<16x32xbf16>
    %cst_122 = arith.constant dense<0.000000e+00> : vector<16x32xf32>
    %359 = tpu.matmul %358, %357, %cst_122 {dimension_numbers = #tpu.dot_dimension_numbers<[1], [0], [0], [1], [0, 0, 1, 1], [], []>} : vector<16x32xbf16>, vector<32x32xbf16>, vector<16x32xf32> -> vector<16x32xf32>
    %360 = vector.extract_strided_slice %356 {offsets = [0, 0], sizes = [1, 32], strides = [1, 1]} : vector<1x96xf32> to vector<1x32xf32>
    %361 = vector.broadcast %360 : vector<1x32xf32> to vector<16x32xf32>
    %362 = arith.addf %359, %361 : vector<16x32xf32>
    %363 = vector.extract_strided_slice %354 {offsets = [0, 32], sizes = [32, 64], strides = [1, 1]} : vector<32x96xbf16> to vector<32x64xbf16>
    %364 = arith.truncf %1 : vector<16x32xf32> to vector<16x32xbf16>
    %cst_123 = arith.constant dense<0.000000e+00> : vector<16x64xf32>
    %365 = tpu.matmul %364, %363, %cst_123 {dimension_numbers = #tpu.dot_dimension_numbers<[1], [0], [0], [1], [0, 0, 1, 1], [], []>} : vector<16x32xbf16>, vector<32x64xbf16>, vector<16x64xf32> -> vector<16x64xf32>
    %366 = vector.extract_strided_slice %356 {offsets = [0, 32], sizes = [1, 64], strides = [1, 1]} : vector<1x96xf32> to vector<1x64xf32>
    %367 = vector.broadcast %366 : vector<1x64xf32> to vector<16x64xf32>
    %368 = arith.addf %365, %367 : vector<16x64xf32>
    %369 = vector.extract_strided_slice %368 {offsets = [0, 0], sizes = [16, 32], strides = [1, 1]} : vector<16x64xf32> to vector<16x32xf32>
    %370 = vector.extract_strided_slice %368 {offsets = [0, 32], sizes = [16, 32], strides = [1, 1]} : vector<16x64xf32> to vector<16x32xf32>
    %c1_124 = arith.constant 1 : index
    %c0_125 = arith.constant 0 : index
    %c384_126 = arith.constant 384 : index
    %371 = vector.load %arg4[%c1_124, %c0_125, %c384_126] : memref<2x32x768xbf16, #tpu.memory_space<vmem>>, vector<1x32x32xbf16>
    %372 = vector.shape_cast %371 : vector<1x32x32xbf16> to vector<32x32xbf16>
    %c1_127 = arith.constant 1 : index
    %c2_128 = arith.constant 2 : index
    %c32_129 = arith.constant 32 : index
    %373 = vector.load %arg5[%c1_127, %c2_128, %c32_129] : memref<3x6x96xf32, #tpu.memory_space<vmem>>, vector<1x1x32xf32>
    %374 = vector.shape_cast %373 : vector<1x1x32xf32> to vector<1x32xf32>
    %375 = vector.extract_strided_slice %362 {offsets = [0, 0], sizes = [16, 16], strides = [1, 1]} : vector<16x32xf32> to vector<16x16xf32>
    %376 = vector.extract_strided_slice %369 {offsets = [0, 0], sizes = [16, 16], strides = [1, 1]} : vector<16x32xf32> to vector<16x16xf32>
    %377 = arith.truncf %375 : vector<16x16xf32> to vector<16x16xbf16>
    %378 = arith.truncf %376 : vector<16x16xf32> to vector<16x16xbf16>
    %cst_130 = arith.constant dense<0.000000e+00> : vector<16x16xf32>
    %379 = tpu.matmul %377, %378, %cst_130 {dimension_numbers = #tpu.dot_dimension_numbers<[1], [1], [0], [0], [0, 0, 1, 0], [], []>} : vector<16x16xbf16>, vector<16x16xbf16>, vector<16x16xf32> -> vector<16x16xf32>
    %380 = arith.addf %379, %3 : vector<16x16xf32>
    %cst_131 = arith.constant dense<0xFF800000> : vector<16xf32>
    %381 = vector.multi_reduction <maximumf>, %380, %cst_131 [1] : vector<16x16xf32> to vector<16xf32>
    %382 = vector.shape_cast %381 : vector<16xf32> to vector<16x1xf32>
    %383 = vector.broadcast %382 : vector<16x1xf32> to vector<16x16xf32>
    %384 = arith.subf %380, %383 : vector<16x16xf32>
    %385 = math.exp %384 : vector<16x16xf32>
    %cst_132 = arith.constant dense<0.000000e+00> : vector<16xf32>
    %386 = vector.multi_reduction <add>, %385, %cst_132 [1] : vector<16x16xf32> to vector<16xf32>
    %387 = vector.shape_cast %386 : vector<16xf32> to vector<16x1xf32>
    %388 = tpu.reciprocal %387 {approx = true} : vector<16x1xf32> -> vector<16x1xf32>
    %389 = vector.broadcast %388 : vector<16x1xf32> to vector<16x16xf32>
    %390 = arith.mulf %385, %389 : vector<16x16xf32>
    %391 = vector.extract_strided_slice %370 {offsets = [0, 0], sizes = [16, 16], strides = [1, 1]} : vector<16x32xf32> to vector<16x16xf32>
    %392 = arith.truncf %391 : vector<16x16xf32> to vector<16x16xbf16>
    %393 = arith.truncf %390 : vector<16x16xf32> to vector<16x16xbf16>
    %cst_133 = arith.constant dense<0.000000e+00> : vector<16x16xf32>
    %394 = tpu.matmul %393, %392, %cst_133 {dimension_numbers = #tpu.dot_dimension_numbers<[1], [0], [0], [1], [0, 0, 1, 1], [], []>} : vector<16x16xbf16>, vector<16x16xbf16>, vector<16x16xf32> -> vector<16x16xf32>
    %395 = vector.extract_strided_slice %372 {offsets = [0, 0], sizes = [16, 32], strides = [1, 1]} : vector<32x32xbf16> to vector<16x32xbf16>
    %396 = arith.truncf %394 : vector<16x16xf32> to vector<16x16xbf16>
    %cst_134 = arith.constant dense<0.000000e+00> : vector<16x32xf32>
    %397 = tpu.matmul %396, %395, %cst_134 {dimension_numbers = #tpu.dot_dimension_numbers<[1], [0], [0], [1], [0, 0, 1, 1], [], []>} : vector<16x16xbf16>, vector<16x32xbf16>, vector<16x32xf32> -> vector<16x32xf32>
    %398 = vector.extract_strided_slice %362 {offsets = [0, 16], sizes = [16, 16], strides = [1, 1]} : vector<16x32xf32> to vector<16x16xf32>
    %399 = vector.extract_strided_slice %369 {offsets = [0, 16], sizes = [16, 16], strides = [1, 1]} : vector<16x32xf32> to vector<16x16xf32>
    %400 = arith.truncf %398 : vector<16x16xf32> to vector<16x16xbf16>
    %401 = arith.truncf %399 : vector<16x16xf32> to vector<16x16xbf16>
    %cst_135 = arith.constant dense<0.000000e+00> : vector<16x16xf32>
    %402 = tpu.matmul %400, %401, %cst_135 {dimension_numbers = #tpu.dot_dimension_numbers<[1], [1], [0], [0], [0, 0, 1, 0], [], []>} : vector<16x16xbf16>, vector<16x16xbf16>, vector<16x16xf32> -> vector<16x16xf32>
    %403 = arith.addf %402, %3 : vector<16x16xf32>
    %cst_136 = arith.constant dense<0xFF800000> : vector<16xf32>
    %404 = vector.multi_reduction <maximumf>, %403, %cst_136 [1] : vector<16x16xf32> to vector<16xf32>
    %405 = vector.shape_cast %404 : vector<16xf32> to vector<16x1xf32>
    %406 = vector.broadcast %405 : vector<16x1xf32> to vector<16x16xf32>
    %407 = arith.subf %403, %406 : vector<16x16xf32>
    %408 = math.exp %407 : vector<16x16xf32>
    %cst_137 = arith.constant dense<0.000000e+00> : vector<16xf32>
    %409 = vector.multi_reduction <add>, %408, %cst_137 [1] : vector<16x16xf32> to vector<16xf32>
    %410 = vector.shape_cast %409 : vector<16xf32> to vector<16x1xf32>
    %411 = tpu.reciprocal %410 {approx = true} : vector<16x1xf32> -> vector<16x1xf32>
    %412 = vector.broadcast %411 : vector<16x1xf32> to vector<16x16xf32>
    %413 = arith.mulf %408, %412 : vector<16x16xf32>
    %414 = vector.extract_strided_slice %370 {offsets = [0, 16], sizes = [16, 16], strides = [1, 1]} : vector<16x32xf32> to vector<16x16xf32>
    %415 = arith.truncf %414 : vector<16x16xf32> to vector<16x16xbf16>
    %416 = arith.truncf %413 : vector<16x16xf32> to vector<16x16xbf16>
    %cst_138 = arith.constant dense<0.000000e+00> : vector<16x16xf32>
    %417 = tpu.matmul %416, %415, %cst_138 {dimension_numbers = #tpu.dot_dimension_numbers<[1], [0], [0], [1], [0, 0, 1, 1], [], []>} : vector<16x16xbf16>, vector<16x16xbf16>, vector<16x16xf32> -> vector<16x16xf32>
    %418 = vector.extract_strided_slice %372 {offsets = [16, 0], sizes = [16, 32], strides = [1, 1]} : vector<32x32xbf16> to vector<16x32xbf16>
    %419 = arith.truncf %417 : vector<16x16xf32> to vector<16x16xbf16>
    %cst_139 = arith.constant dense<0.000000e+00> : vector<16x32xf32>
    %420 = tpu.matmul %419, %418, %cst_139 {dimension_numbers = #tpu.dot_dimension_numbers<[1], [0], [0], [1], [0, 0, 1, 1], [], []>} : vector<16x16xbf16>, vector<16x32xbf16>, vector<16x32xf32> -> vector<16x32xf32>
    %421 = arith.addf %397, %420 : vector<16x32xf32>
    %422 = vector.broadcast %374 : vector<1x32xf32> to vector<16x32xf32>
    %423 = arith.addf %421, %422 : vector<16x32xf32>
    %424 = arith.addf %328, %423 : vector<16x32xf32>
    %425 = vector.extract_strided_slice %237 {offsets = [0, 64], sizes = [1, 32], strides = [1, 1]} : vector<1x96xf32> to vector<1x32xf32>
    %426 = vector.extract_strided_slice %239 {offsets = [0, 64], sizes = [1, 32], strides = [1, 1]} : vector<1x96xf32> to vector<1x32xf32>
    %cst_140 = arith.constant dense<0.000000e+00> : vector<16xf32>
    %427 = vector.multi_reduction <add>, %424, %cst_140 [1] : vector<16x32xf32> to vector<16xf32>
    %428 = vector.shape_cast %427 : vector<16xf32> to vector<16x1xf32>
    %cst_141 = arith.constant 3.200000e+01 : f32
    %429 = vector.broadcast %cst_141 : f32 to vector<16x1xf32>
    %430 = arith.divf %428, %429 : vector<16x1xf32>
    %431 = vector.broadcast %430 : vector<16x1xf32> to vector<16x32xf32>
    %432 = arith.subf %424, %431 : vector<16x32xf32>
    %433 = arith.mulf %432, %432 : vector<16x32xf32>
    %cst_142 = arith.constant dense<0.000000e+00> : vector<16xf32>
    %434 = vector.multi_reduction <add>, %433, %cst_142 [1] : vector<16x32xf32> to vector<16xf32>
    %435 = vector.shape_cast %434 : vector<16xf32> to vector<16x1xf32>
    %cst_143 = arith.constant 3.200000e+01 : f32
    %436 = vector.broadcast %cst_143 : f32 to vector<16x1xf32>
    %437 = arith.divf %435, %436 : vector<16x1xf32>
    %438 = vector.broadcast %430 : vector<16x1xf32> to vector<16x32xf32>
    %439 = arith.subf %424, %438 : vector<16x32xf32>
    %cst_144 = arith.constant 9.99999997E-7 : f32
    %440 = vector.broadcast %cst_144 : f32 to vector<16x1xf32>
    %441 = arith.addf %437, %440 : vector<16x1xf32>
    %442 = math.rsqrt %441 : vector<16x1xf32>
    %443 = vector.broadcast %442 : vector<16x1xf32> to vector<16x32xf32>
    %444 = arith.mulf %439, %443 : vector<16x32xf32>
    %445 = vector.broadcast %425 : vector<1x32xf32> to vector<16x32xf32>
    %446 = arith.mulf %444, %445 : vector<16x32xf32>
    %447 = vector.broadcast %426 : vector<1x32xf32> to vector<16x32xf32>
    %448 = arith.addf %446, %447 : vector<16x32xf32>
    %c1_145 = arith.constant 1 : index
    %c0_146 = arith.constant 0 : index
    %c512_147 = arith.constant 512 : index
    %449 = vector.load %arg4[%c1_145, %c0_146, %c512_147] : memref<2x32x768xbf16, #tpu.memory_space<vmem>>, vector<1x32x64xbf16>
    %450 = vector.shape_cast %449 : vector<1x32x64xbf16> to vector<32x64xbf16>
    %451 = arith.truncf %448 : vector<16x32xf32> to vector<16x32xbf16>
    %cst_148 = arith.constant dense<0.000000e+00> : vector<16x64xf32>
    %452 = tpu.matmul %451, %450, %cst_148 {dimension_numbers = #tpu.dot_dimension_numbers<[1], [0], [0], [1], [0, 0, 1, 1], [], []>} : vector<16x32xbf16>, vector<32x64xbf16>, vector<16x64xf32> -> vector<16x64xf32>
    %c1_149 = arith.constant 1 : index
    %c3_150 = arith.constant 3 : index
    %c0_151 = arith.constant 0 : index
    %453 = vector.load %arg5[%c1_149, %c3_150, %c0_151] : memref<3x6x96xf32, #tpu.memory_space<vmem>>, vector<1x1x64xf32>
    %454 = vector.shape_cast %453 : vector<1x1x64xf32> to vector<1x64xf32>
    %455 = vector.broadcast %454 : vector<1x64xf32> to vector<16x64xf32>
    %456 = arith.addf %452, %455 : vector<16x64xf32>
    %cst_152 = arith.constant 0.000000e+00 : f32
    %457 = vector.broadcast %cst_152 : f32 to vector<16x64xf32>
    %458 = arith.maximumf %456, %457 : vector<16x64xf32>
    %c1_153 = arith.constant 1 : index
    %c0_154 = arith.constant 0 : index
    %c640_155 = arith.constant 640 : index
    %459 = vector.load %arg4[%c1_153, %c0_154, %c640_155] : memref<2x32x768xbf16, #tpu.memory_space<vmem>>, vector<1x32x64xbf16>
    %460 = vector.shape_cast %459 : vector<1x32x64xbf16> to vector<32x64xbf16>
    %461 = arith.truncf %458 : vector<16x64xf32> to vector<16x64xbf16>
    %cst_156 = arith.constant dense<0.000000e+00> : vector<16x32xf32>
    %462 = tpu.matmul %461, %460, %cst_156 {dimension_numbers = #tpu.dot_dimension_numbers<[1], [1], [0], [0], [0, 0, 1, 0], [], []>} : vector<16x64xbf16>, vector<32x64xbf16>, vector<16x32xf32> -> vector<16x32xf32>
    %c1_157 = arith.constant 1 : index
    %c2_158 = arith.constant 2 : index
    %c64_159 = arith.constant 64 : index
    %463 = vector.load %arg5[%c1_157, %c2_158, %c64_159] : memref<3x6x96xf32, #tpu.memory_space<vmem>>, vector<1x1x32xf32>
    %464 = vector.shape_cast %463 : vector<1x1x32xf32> to vector<1x32xf32>
    %465 = vector.broadcast %464 : vector<1x32xf32> to vector<16x32xf32>
    %466 = arith.addf %462, %465 : vector<16x32xf32>
    %467 = arith.addf %424, %466 : vector<16x32xf32>
    %c2_160 = arith.constant 2 : index
    %c0_161 = arith.constant 0 : index
    %c0_162 = arith.constant 0 : index
    %468 = vector.load %arg5[%c2_160, %c0_161, %c0_162] : memref<3x6x96xf32, #tpu.memory_space<vmem>>, vector<1x1x32xf32>
    %469 = vector.shape_cast %468 : vector<1x1x32xf32> to vector<1x32xf32>
    %c2_163 = arith.constant 2 : index
    %c0_164 = arith.constant 0 : index
    %c32_165 = arith.constant 32 : index
    %470 = vector.load %arg5[%c2_163, %c0_164, %c32_165] : memref<3x6x96xf32, #tpu.memory_space<vmem>>, vector<1x1x32xf32>
    %471 = vector.shape_cast %470 : vector<1x1x32xf32> to vector<1x32xf32>
    %cst_166 = arith.constant dense<0.000000e+00> : vector<16xf32>
    %472 = vector.multi_reduction <add>, %467, %cst_166 [1] : vector<16x32xf32> to vector<16xf32>
    %473 = vector.shape_cast %472 : vector<16xf32> to vector<16x1xf32>
    %cst_167 = arith.constant 3.200000e+01 : f32
    %474 = vector.broadcast %cst_167 : f32 to vector<16x1xf32>
    %475 = arith.divf %473, %474 : vector<16x1xf32>
    %476 = vector.broadcast %475 : vector<16x1xf32> to vector<16x32xf32>
    %477 = arith.subf %467, %476 : vector<16x32xf32>
    %478 = arith.mulf %477, %477 : vector<16x32xf32>
    %cst_168 = arith.constant dense<0.000000e+00> : vector<16xf32>
    %479 = vector.multi_reduction <add>, %478, %cst_168 [1] : vector<16x32xf32> to vector<16xf32>
    %480 = vector.shape_cast %479 : vector<16xf32> to vector<16x1xf32>
    %cst_169 = arith.constant 3.200000e+01 : f32
    %481 = vector.broadcast %cst_169 : f32 to vector<16x1xf32>
    %482 = arith.divf %480, %481 : vector<16x1xf32>
    %483 = vector.broadcast %475 : vector<16x1xf32> to vector<16x32xf32>
    %484 = arith.subf %467, %483 : vector<16x32xf32>
    %cst_170 = arith.constant 9.99999997E-7 : f32
    %485 = vector.broadcast %cst_170 : f32 to vector<16x1xf32>
    %486 = arith.addf %482, %485 : vector<16x1xf32>
    %487 = math.rsqrt %486 : vector<16x1xf32>
    %488 = vector.broadcast %487 : vector<16x1xf32> to vector<16x32xf32>
    %489 = arith.mulf %484, %488 : vector<16x32xf32>
    %490 = vector.broadcast %469 : vector<1x32xf32> to vector<16x32xf32>
    %491 = arith.mulf %489, %490 : vector<16x32xf32>
    %492 = vector.broadcast %471 : vector<1x32xf32> to vector<16x32xf32>
    %493 = arith.addf %491, %492 : vector<16x32xf32>
    %c0_171 = arith.constant 0 : index
    %c0_172 = arith.constant 0 : index
    %494 = vector.load %arg6[%c0_171, %c0_172] : memref<16x32xf32, #tpu.memory_space<vmem>>, vector<16x32xf32>
    tpu.vector_store %arg6[%c0_171, %c0_172], %493 {strides = array<i32>} : memref<16x32xf32, #tpu.memory_space<vmem>>, vector<16x32xf32>,
    return
  }
}

</mosaic_0001>

<bundles_post_ra>
// kernel: decoder_forward.1
= control target key start
LH: loop header
LB: loop body
LE: loop exit
PB: predicated region body
PF: predicated region fallthrough
CT: control target
= control target key end

     0   :  { %11 = vsyncpa [#allocation3], 0  ;;  %s2352_s0 = inlined_call_operand.vmem [shape: f32[16,32], index: 0, kind: input, shape index: {}]   ;;  %s2353_s1 = inlined_call_operand.vmem [shape: f32[16,32], index: 1, kind: input, shape index: {}]   ;;  %s2354_s2 = inlined_call_operand.vmem [shape: f32[16,16], index: 2, kind: input, shape index: {}]   ;;  %s2355_s3 = inlined_call_operand.vmem [shape: f32[16,16], index: 3, kind: input, shape index: {}]   ;;  %s2356_s4 = inlined_call_operand.hbm [shape: bf16[2,32,768], index: 4, kind: input, shape index: {}]   ;;  %s2357_s5 = inlined_call_operand.vmem [shape: f32[3,6,96], index: 5, kind: input, shape index: {}]   ;;  %s2358_s6 = inlined_call_operand.hbm [shape: f32[16,32], index: 6, kind: output, shape index: {}]  }
   0x1   :  { %12 = vsyncpa [#allocation4], 0  ;;  %s25_s23 = sshll.u32 %s2356_s4, 4  ;;  %s1923_s24 = smov [#allocation2]   ;;  %s26_s23 = int_to_ptr.hbm [resolvable:$true] %s25_s23 }
   0x2   :  { %s27_s25 = sshll.u32 %s1923_s24, 4  ;;  %s1924_s26 = smov 384   ;;  %s28_s25 = int_to_ptr.vmem [resolvable:$true] %s27_s25 }
   0x3   :  { %s1925_s27 = smov 24  }
   0x4   :  { %33 = dma.hbm_to_vmem [thread:$0]  %s26_s23, 3072, %s28_s25, [#allocation3], %s1924_s26, %s1924_s26, %s1925_s27  }
   0x5   :  { %1919 = dma.done.wait [#allocation3], 3072  }
   0x6   :  { %1920 = vsyncadd [#allocation3], 4294964224  ;;  %vm51_vm0 = vcmask 261120   ;;  %v1976_v0 = vld [vmem:[%s2352_s0] sm:$0xff]  ;;  %v1983_v2 = vld [vmem:[%s2352_s0 + $0x8] sm:$0xff]  ;;  %v1926_v4 = vmov 32.0  }
   0x7   :  { %v52_v1 = vsel %vm51_vm0, %v1976_v0, 0.0  ;;  %v55_v3 = vsel %vm51_vm0, %v1983_v2, 0.0  ;;  %1777 = vrcp.f32 %v1926_v4  ;;  %v1597_v21 = vld [vmem:[#allocation2 + $0x30] sm:$0xf]  ;;  %v1729_v22 = vld [vmem:[#allocation2 + $0x44] sm:$0xf0] }
   0x8   :  { %53 = vadd.xlane.f32.xlu0 %v52_v1  ;;  %v1598_v23 = vor.u32 %v1729_v22, %v1597_v21  ;;  %v1593_v24 = vld [vmem:[#allocation2] sm:$0xf]  ;;  %v1728_v25 = vld [vmem:[#allocation2 + $0x14] sm:$0xf0]  ;;  %v2000_v46 = vld [vmem:[%s2357_s5 + $0x4] ss:$0 sm:$0xff] }
   0x9   :  { %v1594_v27 = vor.u32 %v1728_v25, %v1593_v24  ;;  %v2006_v51 = vld [vmem:[%s2357_s5 + $0x5] ss:$0 sm:$0xff]  ;;  %v1766_v57 = vld [vmem:[%s2357_s5] ss:$0 sm:$0xff]  ;;  %s1927_s12 = smov 112   ;;  %s1928_s13 = smov 96  }
   0xa   :  { %137 = vmatpush.bf16.msra.mxu0 %v1598_v23  ;;  %s1929_s14 = smov 80   ;;  %vm154_vm8 = vcmask 130048   ;;  %s1931_s19 = smov 48  }
   0xb   :  { %s1578_s22 = sshll.u32 %s2358_s6, 4  ;;  %s1933_s23 = smov 128   ;;  %s1579_s22 = int_to_ptr.hbm [resolvable:$true] %s1578_s22 }
   0xc   :  { %s1934_s24 = smov 8  }
   0xd   :  { %v1778_v5 = vpop.eup %1777 }
   0xe   :  { %v59_v6 = vmul.f32 32.0, %v1778_v5  ;;  %vm63_vm1 = vweird.f32 %v1778_v5  ;;  %138 = vmatpush.bf16.msra.mxu0 %v1594_v27 }
  0x10   :  { %56 = vadd.xlane.f32.xlu0 %v55_v3  ;;  %v60_v7 = vsub.f32 1.0, %v59_v6 }
  0x12   :  { %v61_v8 = vmul.f32 %v1778_v5, %v60_v7 }
  0x14   :  { %v62_v9 = vadd.f32 %v1778_v5, %v61_v8 }
  0x16   :  { %v1987_v10 = vsel %vm63_vm1, %v1778_v5, %v62_v9  ;;  %v2031_v5 = vld [vmem:[%s2354_s2] sm:$0xff]  ;;  %v2038_v9 = vld [vmem:[%s2354_s2 + $0x8] sm:$0xff]  ;;  %s1930_s2 = smov 64  }
  0x7b   :  { %v54_v11 = vpop.xlane.xlu0 %53 }
  0x7c   :  { %v65_v12 = vmul.f32 %v1987_v10, %v54_v11 }
  0x7e   :  { %v67_v13 = vsub.f32 %v1976_v0, %v65_v12 }
  0x80   :  { %v69_v14 = vmul.f32 %v67_v13, %v67_v13 }
  0x82   :  { %v71_v15 = vsel %vm51_vm0, %v69_v14, 0.0 }
  0x83   :  { %72 = vadd.xlane.f32.xlu1 %v71_v15  ;;  %v57_v16 = vpop.xlane.xlu0 %56 }
  0x84   :  { %v66_v17 = vmul.f32 %v1987_v10, %v57_v16 }
  0x86   :  { %v68_v18 = vsub.f32 %v1983_v2, %v66_v17 }
  0x88   :  { %v70_v19 = vmul.f32 %v68_v18, %v68_v18 }
  0x8a   :  { %v74_v20 = vsel %vm51_vm0, %v70_v19, 0.0 }
  0x8b   :  { %75 = vadd.xlane.f32.xlu1 %v74_v20 }
  0xf6   :  { %v73_v26 = vpop.xlane.xlu1 %72 }
  0xf7   :  { %v77_v28 = vmul.f32 %v73_v26, %v1987_v10 }
  0xf9   :  { %v79_v29 = vadd.f32 1e-06, %v77_v28 }
  0xfb   :  { %1779 = vrsqrt.f32 %v79_v29  ;;  %vm87_vm3 = vweird.f32 %v79_v29 }
  0xfe   :  { %v76_v30 = vpop.xlane.xlu1 %75 }
  0xff   :  { %v78_v31 = vmul.f32 %v76_v30, %v1987_v10 }
 0x101   :  { %v1780_v32 = vpop.eup %1779  ;;  %v80_v33 = vadd.f32 1e-06, %v78_v31 }
 0x102   :  { %v82_v34 = vmul.f32 %v1780_v32, %v79_v29  ;;  %vm88_vm2 = vweird.f32 %v1780_v32 }
 0x103   :  { %1781 = vrsqrt.f32 %v80_v33  ;;  %vm89_vm4 = vmor %vm87_vm3, %vm88_vm2  ;;  %vm97_vm6 = vweird.f32 %v80_v33 }
 0x104   :  { %v83_v35 = vmul.f32 %v1780_v32, %v82_v34 }
 0x106   :  { %v84_v36 = vmul.f32 0.5, %v83_v35 }
 0x108   :  { %v85_v37 = vsub.f32 1.5, %v84_v36 }
 0x109   :  { %v1782_v38 = vpop.eup %1781 }
 0x10a   :  { %v86_v39 = vmul.f32 %v1780_v32, %v85_v37  ;;  %v92_v40 = vmul.f32 %v1782_v38, %v80_v33  ;;  %vm98_vm5 = vweird.f32 %v1782_v38 }
 0x10b   :  { %vm99_vm7 = vmor %vm97_vm6, %vm98_vm5  ;;  %vm762_vm6 = vcmask 523264  }
 0x10c   :  { %v93_v41 = vmul.f32 %v1782_v38, %v92_v40  ;;  %v90_v42 = vsel %vm89_vm4, %v1780_v32, %v86_v39 }
 0x10d   :  { %v101_v45 = vmul.f32 %v90_v42, %v67_v13 }
 0x10e   :  { %v94_v43 = vmul.f32 0.5, %v93_v41 }
 0x10f   :  { %v104_v50 = vmul.f32 %v2000_v46, %v101_v45 }
 0x110   :  { %v95_v44 = vsub.f32 1.5, %v94_v43 }
 0x111   :  { %v107_v53 = vadd.f32 %v2006_v51, %v104_v50 }
 0x112   :  { %v96_v47 = vmul.f32 %v1782_v38, %v95_v44 }
 0x114   :  { %v100_v48 = vsel %vm99_vm7, %v1782_v38, %v96_v47 }
 0x115   :  { %v102_v49 = vmul.f32 %v100_v48, %v68_v18 }
 0x117   :  { %v105_v52 = vmul.f32 %v2000_v46, %v102_v49 }
 0x119   :  { %v108_v54 = vadd.f32 %v2006_v51, %v105_v52 }
 0x11b   :  { %v113_v55 = vpack.c.bf16 %v108_v54, %v107_v53 }
 0x11d   :  { %1599 = vmatmul.msk.bf16.vlgmr.msra.gmra.mxu0 %vm51_vm0, %v113_v55 }
 0x19a   :  { %v140_v56 = vpop.f32.mrf.mxu0 }
 0x19b   :  { %v141_v59 = vadd.f32 %v1766_v57, %v140_v56 }
 0x1a2   :  { %v142_v58 = vpop.f32.mrf.mxu0 }
 0x1a3   :  { %v143_v60 = vadd.f32 %v1766_v57, %v142_v58  ;;  %v1611_v58 = vld [vmem:[#allocation2 + $0x8] sm:$0xf] }
 0x1a5   :  { %v2015_v61 = vpack.c.bf16 %v143_v60, %v141_v59  ;;  %v1730_v59 = vld [vmem:[#allocation2 + $0x1c] sm:$0xf0] }
 0x1a6   :  { %v1612_v60 = vor.u32 %v1730_v59, %v1611_v58 }
 0x1a7   :  { %219 = vrot.lane.b32.xlu0 %v2015_v61, %s1927_s12  ;;  %152 = vrot.lane.b32.xlu2 %v2015_v61, %s1928_s13 }
 0x1af   :  { %221 = vrot.lane.b32.xlu2 %v2015_v61, %s1929_s14 }
 0x201   :  { %v153_v62 = vpop.permute.xlu2 %152 }
 0x202   :  { %v159_v63 = vsel %vm154_vm8, %v153_v62, 0  ;;  %v1731_v62 = vld [vmem:[#allocation2 + $0x4c] sm:$0xf0] }
 0x203   :  { %168 = vmatpush.bf16.xpose.msra.mxu1 %v159_v63 }
 0x209   :  { %v222_v1 = vpop.permute.xlu2 %221 }
 0x20a   :  { %1600 = vmatmul.msk.bf16.vlgmr.msra.gmra.mxu1 %vm154_vm8, %v2015_v61  ;;  %v227_v3 = vsel %vm154_vm8, %v222_v1, 0 }
 0x20b   :  { %236 = vmatpush.bf16.xpose.msra.mxu3 %v227_v3  ;;  %326 = vmatpush.bf16.msrb.mxu1 %v1612_v60 }
 0x219   :  { %v220_v4 = vpop.permute.xlu0 %219 }
 0x21a   :  { %1602 = vmatmul.msk.bf16.vlgmr.msra.gmra.mxu3 %vm154_vm8, %v220_v4 }
 0x287   :  { %v170_v6 = vpop.f32.mrf.mxu1 }
 0x288   :  { %v171_v7 = vadd.f32 %v170_v6, %v2031_v5 }
 0x28a   :  { %v175_v8 = vsel %vm154_vm8, %v171_v7, -inf }
 0x28b   :  { %176 = vmax.xlane.f32.xlu1 %v175_v8 }
 0x28f   :  { %v172_v11 = vpop.f32.mrf.mxu1 }
 0x290   :  { %v173_v12 = vadd.f32 %v172_v11, %v2038_v9  ;;  %v1620_v11 = vld [vmem:[#allocation2 + $0x34] sm:$0xf] }
 0x292   :  { %v178_v13 = vsel %vm154_vm8, %v173_v12, -inf }
 0x293   :  { %179 = vmax.xlane.f32.xlu2 %v178_v13 }
 0x29d   :  { %v238_v14 = vpop.f32.mrf.mxu3 }
 0x29e   :  { %v239_v15 = vadd.f32 %v238_v14, %v2031_v5 }
 0x2a0   :  { %v243_v16 = vsel %vm154_vm8, %v239_v15, -inf }
 0x2a1   :  { %244 = vmax.xlane.f32.xlu1 %v243_v16 }
 0x2a5   :  { %v240_v17 = vpop.f32.mrf.mxu3 }
 0x2a6   :  { %v241_v18 = vadd.f32 %v240_v17, %v2038_v9 }
 0x2a8   :  { %v246_v19 = vsel %vm154_vm8, %v241_v18, -inf }
 0x2a9   :  { %247 = vmax.xlane.f32.xlu1 %v246_v19  ;;  %v1616_v19 = vld [vmem:[#allocation2 + $0x4] sm:$0xf] }
 0x2c2   :  { %198 = vrot.lane.b32.xlu1 %v2015_v61, %s1930_s2 }
 0x2fe   :  { %v177_v20 = vpop.xlane.xlu1 %176 }
 0x2ff   :  { %v181_v21 = vsub.f32 %v171_v7, %v177_v20  ;;  %v1732_v20 = vld [vmem:[#allocation2 + $0x18] sm:$0xf0] }
 0x301   :  { %v183_v22 = vmul.f32 1.442695, %v181_v21 }
 0x303   :  { %1783 = vpow2.f32 %v183_v22  ;;  %v1617_v22 = vor.u32 %v1732_v20, %v1616_v19 }
 0x306   :  { %v180_v23 = vpop.xlane.xlu2 %179 }
 0x307   :  { %v182_v24 = vsub.f32 %v173_v12, %v180_v23  ;;  %v1733_v12 = vld [vmem:[#allocation2 + $0x48] sm:$0xf0] }
 0x308   :  { %v1621_v13 = vor.u32 %v1733_v12, %v1620_v11 }
 0x309   :  { %v1784_v25 = vpop.eup %1783  ;;  %v185_v26 = vmul.f32 1.442695, %v182_v24 }
 0x30a   :  { %v187_v27 = vsel %vm154_vm8, %v1784_v25, 0.0  ;;  %422 = vmatpush.bf16.msrb.mxu3 %v1621_v13 }
 0x30b   :  { %1785 = vpow2.f32 %v185_v26  ;;  %188 = vadd.xlane.f32.xlu0 %v187_v27 }
 0x30e   :  { %423 = vmatpush.bf16.msrb.mxu3 %v1617_v22 }
 0x311   :  { %v1786_v28 = vpop.eup %1785 }
 0x312   :  { %v190_v29 = vsel %vm154_vm8, %v1786_v28, 0.0 }
 0x313   :  { %191 = vadd.xlane.f32.xlu1 %v190_v29 }
 0x314   :  { %v245_v30 = vpop.xlane.xlu1 %244 }
 0x315   :  { %v249_v31 = vsub.f32 %v239_v15, %v245_v30  ;;  %v2061_v15 = vld [vmem:[%s2357_s5 + $0x2] ss:$0 sm:$0xff] }
 0x317   :  { %v251_v32 = vmul.f32 1.442695, %v249_v31 }
 0x319   :  { %1787 = vpow2.f32 %v251_v32 }
 0x31c   :  { %v248_v33 = vpop.xlane.xlu1 %247 }
 0x31d   :  { %v250_v34 = vsub.f32 %v241_v18, %v248_v33 }
 0x31f   :  { %v1788_v35 = vpop.eup %1787  ;;  %v253_v36 = vmul.f32 1.442695, %v250_v34 }
 0x320   :  { %v255_v37 = vsel %vm154_vm8, %v1788_v35, 0.0 }
 0x321   :  { %1789 = vpow2.f32 %v253_v36  ;;  %256 = vadd.xlane.f32.xlu2 %v255_v37 }
 0x327   :  { %v1790_v38 = vpop.eup %1789 }
 0x328   :  { %v258_v39 = vsel %vm154_vm8, %v1790_v38, 0.0 }
 0x329   :  { %259 = vadd.xlane.f32.xlu2 %v258_v39 }
 0x32c   :  { %266 = vrot.lane.b32.xlu1 %v2015_v61, %s1931_s19  ;;  %v1606_v61 = vld [vmem:[#allocation2 + $0x38] sm:$0xf] }
 0x32d   :  { %v1607_v63 = vor.u32 %v1731_v62, %v1606_v61 }
 0x32f   :  { %303 = vmatpush.bf16.msrb.mxu0 %v1607_v63 }
 0x334   :  { %v199_v40 = vpop.permute.xlu1 %198 }
 0x335   :  { %211 = vmatpush.bf16.msra.mxu2 %v199_v40  ;;  %v43_v40 = vld [vmem:[%s2353_s1] sm:$0xff] }
 0x37e   :  { %v189_v41 = vpop.xlane.xlu0 %188 }
 0x37f   :  { %1791 = vrcp.f32 %v189_v41  ;;  %v44_v41 = vld [vmem:[%s2353_s1 + $0x8] sm:$0xff] }
 0x385   :  { %v1792_v43 = vpop.eup %1791 }
 0x386   :  { %v192_v42 = vpop.xlane.xlu1 %191  ;;  %v195_v45 = vmul.f32 %v1792_v43, %v1784_v25 }
 0x387   :  { %1793 = vrcp.f32 %v192_v42  ;;  %v2093_v42 = vpack.c.bf16 %v44_v41, %v43_v40  ;;  %v2128_v41 = vld [vmem:[%s2355_s3 + $0x8] sm:$0xff] }
 0x38d   :  { %v1794_v44 = vpop.eup %1793 }
 0x38e   :  { %v196_v47 = vmul.f32 %v1794_v44, %v1786_v28 }
 0x390   :  { %v197_v48 = vpack.c.bf16 %v196_v47, %v195_v45  ;;  %v1768_v47 = vld [vmem:[%s2357_s5 + $0x1] ss:$0 sm:$0xff] }
 0x392   :  { %1601 = vmatmul.msk.bf16.vlgmr.msra.gmra.mxu2 %vm154_vm8, %v197_v48 }
 0x394   :  { %v257_v49 = vpop.xlane.xlu2 %256 }
 0x395   :  { %1795 = vrcp.f32 %v257_v49 }
 0x39b   :  { %v1796_v53 = vpop.eup %1795 }
 0x39c   :  { %v260_v50 = vpop.xlane.xlu2 %259  ;;  %v263_v55 = vmul.f32 %v1796_v53, %v1788_v35 }
 0x39d   :  { %1797 = vrcp.f32 %v260_v50 }
 0x39e   :  { %v267_v52 = vpop.permute.xlu1 %266 }
 0x39f   :  { %279 = vmatpush.bf16.msrb.mxu2 %v267_v52 }
 0x3a3   :  { %v1798_v54 = vpop.eup %1797 }
 0x3a4   :  { %v264_v56 = vmul.f32 %v1798_v54, %v1790_v38 }
 0x3a6   :  { %v265_v57 = vpack.c.bf16 %v264_v56, %v263_v55 }
 0x3a8   :  { %1603 = vmatmul.msk.bf16.vlgmr.msrb.gmra.mxu2 %vm154_vm8, %v265_v57 }
 0x415   :  { %v213_v1 = vpop.f32.mrf.mxu2 }
 0x41d   :  { %v215_v3 = vpop.f32.mrf.mxu2 }
 0x41e   :  { %v218_v4 = vpack.c.bf16 %v215_v3, %v213_v1 }
 0x420   :  { %1613 = vmatmul.msk.bf16.vlgmr.msrb.gmra.mxu1 %vm154_vm8, %v218_v4 }
 0x42b   :  { %v281_v6 = vpop.f32.mrf.mxu2 }
 0x433   :  { %v283_v7 = vpop.f32.mrf.mxu2 }
 0x434   :  { %v286_v8 = vpack.c.bf16 %v283_v7, %v281_v6 }
 0x436   :  { %1608 = vmatmul.msk.bf16.vlgmr.msrb.gmra.mxu0 %vm154_vm8, %v286_v8 }
 0x49d   :  { %v328_v14 = vpop.f32.mrf.mxu1 }
 0x4a5   :  { %v330_v24 = vpop.f32.mrf.mxu1 }
 0x4b3   :  { %v305_v16 = vpop.f32.mrf.mxu0 }
 0x4b4   :  { %v329_v17 = vadd.f32 %v328_v14, %v305_v16 }
 0x4b6   :  { %v334_v18 = vadd.f32 %v2061_v15, %v329_v17 }
 0x4b8   :  { %v2065_v21 = vadd.f32 %v334_v18, %v1976_v0 }
 0x4ba   :  { %v338_v23 = vsel %vm51_vm0, %v2065_v21, 0.0 }
 0x4bb   :  { %339 = vadd.xlane.f32.xlu2 %v338_v23  ;;  %v307_v25 = vpop.f32.mrf.mxu0 }
 0x4bc   :  { %v331_v26 = vadd.f32 %v330_v24, %v307_v25 }
 0x4be   :  { %v335_v27 = vadd.f32 %v2061_v15, %v331_v26 }
 0x4c0   :  { %v2071_v28 = vadd.f32 %v335_v27, %v1983_v2 }
 0x4c2   :  { %v341_v29 = vsel %vm51_vm0, %v2071_v28, 0.0 }
 0x4c3   :  { %342 = vadd.xlane.f32.xlu0 %v341_v29 }
 0x4d3   :  { %431 = vrot.lane.b32.xlu2 %v1617_v22, %s1928_s13 }
 0x4d7   :  { %433 = vrot.lane.b32.xlu0 %v1621_v13, %s1928_s13 }
 0x4df   :  { %383 = vrot.lane.b32.xlu0 %v2000_v46, %s1928_s13 }
 0x4e7   :  { %438 = vrot.lane.b32.xlu0 %v1768_v47, %s1928_s13 }
 0x52e   :  { %v340_v0 = vpop.xlane.xlu2 %339 }
 0x52f   :  { %v344_v30 = vmul.f32 %v340_v0, %v1987_v10 }
 0x531   :  { %v346_v31 = vsub.f32 %v2065_v21, %v344_v30 }
 0x533   :  { %v348_v32 = vmul.f32 %v346_v31, %v346_v31 }
 0x535   :  { %v350_v2 = vsel %vm51_vm0, %v348_v32, 0.0 }
 0x536   :  { %351 = vadd.xlane.f32.xlu1 %v350_v2  ;;  %v343_v33 = vpop.xlane.xlu0 %342  ;;  %v432_v39 = vpop.permute.xlu2 %431  ;;  %v2117_v2 = vld [vmem:[%s2355_s3] sm:$0xff] }
 0x537   :  { %v345_v34 = vmul.f32 %v343_v33, %v1987_v10 }
 0x539   :  { %v347_v35 = vsub.f32 %v2071_v28, %v345_v34 }
 0x53b   :  { %v349_v36 = vmul.f32 %v347_v35, %v347_v35 }
 0x53d   :  { %v353_v37 = vsel %vm51_vm0, %v349_v36, 0.0 }
 0x53e   :  { %354 = vadd.xlane.f32.xlu2 %v353_v37 }
 0x549   :  { %v434_v38 = vpop.permute.xlu0 %433 }
 0x54a   :  { %450 = vmatpush.bf16.msra.mxu2 %v434_v38 }
 0x54e   :  { %451 = vmatpush.bf16.msra.mxu2 %v432_v39 }
 0x551   :  { %1623 = vmatmul.msk.bf16.vlgmr.msra.gmra.mxu2 %vm51_vm0, %v2093_v42  ;;  %v384_v4 = vpop.permute.xlu0 %383 }
 0x556   :  { %389 = vrot.lane.b32.xlu2 %v2006_v51, %s1928_s13 }
 0x559   :  { %v439_v19 = vpop.permute.xlu0 %438 }
 0x5a9   :  { %v352_v43 = vpop.xlane.xlu1 %351 }
 0x5aa   :  { %v356_v44 = vmul.f32 %v352_v43, %v1987_v10 }
 0x5ac   :  { %v358_v45 = vadd.f32 1e-06, %v356_v44 }
 0x5ae   :  { %1799 = vrsqrt.f32 %v358_v45  ;;  %vm366_vm10 = vweird.f32 %v358_v45 }
 0x5b1   :  { %v355_v48 = vpop.xlane.xlu2 %354 }
 0x5b2   :  { %v357_v49 = vmul.f32 %v355_v48, %v1987_v10 }
 0x5b4   :  { %v1800_v50 = vpop.eup %1799  ;;  %v359_v52 = vadd.f32 1e-06, %v357_v49 }
 0x5b5   :  { %v361_v53 = vmul.f32 %v1800_v50, %v358_v45  ;;  %vm367_vm9 = vweird.f32 %v1800_v50 }
 0x5b6   :  { %1801 = vrsqrt.f32 %v359_v52  ;;  %vm368_vm11 = vmor %vm366_vm10, %vm367_vm9  ;;  %vm376_vm13 = vweird.f32 %v359_v52 }
 0x5b7   :  { %v362_v54 = vmul.f32 %v1800_v50, %v361_v53 }
 0x5b9   :  { %v363_v55 = vmul.f32 0.5, %v362_v54  ;;  %v390_v11 = vpop.permute.xlu2 %389 }
 0x5bb   :  { %v364_v56 = vsub.f32 1.5, %v363_v55 }
 0x5bc   :  { %v1802_v57 = vpop.eup %1801 }
 0x5bd   :  { %v371_v58 = vmul.f32 %v1802_v57, %v359_v52  ;;  %v365_v59 = vmul.f32 %v1800_v50, %v364_v56  ;;  %vm377_vm12 = vweird.f32 %v1802_v57 }
 0x5be   :  { %vm378_vm14 = vmor %vm376_vm13, %vm377_vm12 }
 0x5bf   :  { %v372_v60 = vmul.f32 %v1802_v57, %v371_v58  ;;  %v369_v62 = vsel %vm368_vm11, %v1800_v50, %v365_v59 }
 0x5c0   :  { %v380_v1 = vmul.f32 %v369_v62, %v346_v31 }
 0x5c1   :  { %v373_v61 = vmul.f32 0.5, %v372_v60 }
 0x5c2   :  { %v386_v8 = vmul.f32 %v384_v4, %v380_v1 }
 0x5c3   :  { %v374_v63 = vsub.f32 1.5, %v373_v61 }
 0x5c4   :  { %v392_v13 = vadd.f32 %v390_v11, %v386_v8 }
 0x5c5   :  { %v375_v3 = vmul.f32 %v1802_v57, %v374_v63 }
 0x5c7   :  { %v379_v6 = vsel %vm378_vm14, %v1802_v57, %v375_v3 }
 0x5c8   :  { %v381_v7 = vmul.f32 %v379_v6, %v347_v35 }
 0x5ca   :  { %v387_v12 = vmul.f32 %v384_v4, %v381_v7 }
 0x5cc   :  { %v393_v14 = vadd.f32 %v390_v11, %v387_v12 }
 0x5ce   :  { %v399_v16 = vpack.c.bf16 %v393_v14, %v392_v13 }
 0x5d0   :  { %1622 = vmatmul.msk.bf16.vlgmr.msrb.gmra.mxu3 %vm51_vm0, %v399_v16 }
 0x5d4   :  { %v453_v17 = vpop.f32.mrf.mxu2 }
 0x5d5   :  { %v454_v20 = vadd.f32 %v453_v17, %v439_v19 }
 0x5dc   :  { %v455_v18 = vpop.f32.mrf.mxu2 }
 0x5dd   :  { %v456_v22 = vadd.f32 %v455_v18, %v439_v19 }
 0x5df   :  { %v2104_v23 = vpack.c.bf16 %v456_v22, %v454_v20 }
 0x5e1   :  { %v468_v24 = vsel %vm154_vm8, %v2104_v23, 0  ;;  %532 = vrot.lane.b32.xlu2 %v2104_v23, %s1927_s12 }
 0x5e2   :  { %477 = vmatpush.bf16.xpose.msra.mxu0 %v468_v24 }
 0x63b   :  { %v533_v30 = vpop.permute.xlu2 %532 }
 0x63c   :  { %v538_v31 = vsel %vm154_vm8, %v533_v30, 0 }
 0x63d   :  { %547 = vmatpush.bf16.xpose.msra.mxu3 %v538_v31  ;;  %v1635_v31 = vld [vmem:[#allocation2 + $0xc] sm:$0xf] }
 0x653   :  { %v425_v25 = vpop.f32.mrf.mxu3 }
 0x654   :  { %v426_v27 = vadd.f32 %v1768_v47, %v425_v25 }
 0x65b   :  { %v427_v26 = vpop.f32.mrf.mxu3 }
 0x65c   :  { %v428_v29 = vadd.f32 %v1768_v47, %v427_v26 }
 0x65e   :  { %v462_v0 = vpack.c.bf16 %v428_v29, %v426_v27  ;;  %v1630_v29 = vld [vmem:[#allocation2 + $0x3c] sm:$0xf] }
 0x660   :  { %530 = vrot.lane.b32.xlu0 %v462_v0, %s1927_s12  ;;  %1624 = vmatmul.msk.bf16.vlgmr.msra.gmra.mxu0 %vm154_vm8, %v462_v0  ;;  %v1735_v0 = vld [vmem:[#allocation2 + $0x50] sm:$0xf0] }
 0x661   :  { %v1631_v30 = vor.u32 %v1735_v0, %v1630_v29 }
 0x663   :  { %614 = vmatpush.bf16.msrb.mxu0 %v1631_v30 }
 0x6d2   :  { %v531_v32 = vpop.permute.xlu0 %530 }
 0x6d3   :  { %1626 = vmatmul.msk.bf16.vlgmr.msra.gmra.mxu3 %vm154_vm8, %v531_v32  ;;  %v1734_v32 = vld [vmem:[#allocation2 + $0x20] sm:$0xf0] }
 0x6dd   :  { %v479_v33 = vpop.f32.mrf.mxu0 }
 0x6de   :  { %v480_v34 = vadd.f32 %v479_v33, %v2117_v2  ;;  %v1636_v33 = vor.u32 %v1734_v32, %v1635_v31 }
 0x6e0   :  { %v484_v35 = vsel %vm154_vm8, %v480_v34, -inf }
 0x6e1   :  { %485 = vmax.xlane.f32.xlu0 %v484_v35 }
 0x6e5   :  { %v481_v43 = vpop.f32.mrf.mxu0 }
 0x6e6   :  { %v482_v45 = vadd.f32 %v481_v43, %v2128_v41 }
 0x6e8   :  { %v487_v50 = vsel %vm154_vm8, %v482_v45, -inf }
 0x6f5   :  { %645 = vrot.lane.b32.xlu0 %v2061_v15, %s1928_s13 }
 0x754   :  { %v486_v36 = vpop.xlane.xlu0 %485 }
 0x755   :  { %v490_v39 = vsub.f32 %v480_v34, %v486_v36 }
 0x756   :  { %v549_v37 = vpop.f32.mrf.mxu3 }
 0x757   :  { %v550_v38 = vadd.f32 %v549_v37, %v2117_v2  ;;  %v492_v44 = vmul.f32 1.442695, %v490_v39 }
 0x759   :  { %v554_v40 = vsel %vm154_vm8, %v550_v38, -inf  ;;  %1803 = vpow2.f32 %v492_v44 }
 0x75a   :  { %555 = vmax.xlane.f32.xlu1 %v554_v40 }
 0x75e   :  { %v551_v47 = vpop.f32.mrf.mxu3 }
 0x75f   :  { %v552_v48 = vadd.f32 %v551_v47, %v2128_v41  ;;  %v1804_v52 = vpop.eup %1803 }
 0x760   :  { %v496_v53 = vsel %vm154_vm8, %v1804_v52, 0.0 }
 0x761   :  { %v557_v49 = vsel %vm154_vm8, %v552_v48, -inf }
 0x762   :  { %558 = vmax.xlane.f32.xlu2 %v557_v49  ;;  %488 = vmax.xlane.f32.xlu1 %v487_v50 }
 0x767   :  { %v646_v44 = vpop.permute.xlu0 %645 }
 0x76a   :  { %497 = vadd.xlane.f32.xlu1 %v496_v53 }
 0x77a   :  { %577 = vrot.lane.b32.xlu2 %v2104_v23, %s1929_s14 }
 0x7cd   :  { %v556_v54 = vpop.xlane.xlu1 %555 }
 0x7ce   :  { %v560_v59 = vsub.f32 %v550_v38, %v556_v54 }
 0x7d0   :  { %v562_v60 = vmul.f32 1.442695, %v560_v59 }
 0x7d5   :  { %v559_v55 = vpop.xlane.xlu2 %558  ;;  %v489_v56 = vpop.xlane.xlu1 %488 }
 0x7d6   :  { %v491_v57 = vsub.f32 %v482_v45, %v489_v56  ;;  %v561_v63 = vsub.f32 %v552_v48, %v559_v55 }
 0x7d8   :  { %v494_v58 = vmul.f32 1.442695, %v491_v57  ;;  %v564_v3 = vmul.f32 1.442695, %v561_v63 }
 0x7da   :  { %1805 = vpow2.f32 %v494_v58 }
 0x7db   :  { %1807 = vpow2.f32 %v562_v60 }
 0x7dc   :  { %1809 = vpow2.f32 %v564_v3  ;;  %v1737_v3 = vld [vmem:[#allocation2 + $0x54] sm:$0xf0] }
 0x7dd   :  { %v578_v61 = vpop.permute.xlu2 %577  ;;  %v498_v11 = vpop.xlane.xlu1 %497 }
 0x7de   :  { %590 = vmatpush.bf16.msrb.mxu2 %v578_v61 }
 0x7e0   :  { %v1806_v62 = vpop.eup %1805 }
 0x7e1   :  { %v499_v1 = vsel %vm154_vm8, %v1806_v62, 0.0  ;;  %v1808_v4 = vpop.eup %1807 }
 0x7e2   :  { %500 = vadd.xlane.f32.xlu1 %v499_v1  ;;  %v566_v6 = vsel %vm154_vm8, %v1808_v4, 0.0  ;;  %v1810_v7 = vpop.eup %1809 }
 0x7e3   :  { %v569_v8 = vsel %vm154_vm8, %v1810_v7, 0.0 }
 0x7ea   :  { %567 = vadd.xlane.f32.xlu1 %v566_v6 }
 0x7f2   :  { %570 = vadd.xlane.f32.xlu1 %v569_v8  ;;  %v1640_v8 = vld [vmem:[#allocation2 + $0x10] sm:$0xf] }
 0x80b   :  { %508 = vrot.lane.b32.xlu1 %v2104_v23, %s1928_s13 }
 0x855   :  { %v501_v12 = vpop.xlane.xlu1 %500 }
 0x85d   :  { %v568_v13 = vpop.xlane.xlu1 %567 }
 0x85e   :  { %1811 = vrcp.f32 %v568_v13 }
 0x864   :  { %v1812_v16 = vpop.eup %1811 }
 0x865   :  { %v571_v14 = vpop.xlane.xlu1 %570  ;;  %v574_v18 = vmul.f32 %v1812_v16, %v1808_v4 }
 0x866   :  { %1813 = vrcp.f32 %v571_v14 }
 0x867   :  { %1815 = vrcp.f32 %v501_v12 }
 0x868   :  { %1817 = vrcp.f32 %v498_v11  ;;  %v1736_v11 = vld [vmem:[#allocation2 + $0x24] sm:$0xf0] }
 0x869   :  { %v1641_v12 = vor.u32 %v1736_v11, %v1640_v8 }
 0x86c   :  { %v1814_v17 = vpop.eup %1813 }
 0x86d   :  { %v575_v19 = vmul.f32 %v1814_v17, %v1810_v7  ;;  %v1816_v22 = vpop.eup %1815 }
 0x86e   :  { %v1818_v24 = vpop.eup %1817  ;;  %v505_v25 = vmul.f32 %v1816_v22, %v1806_v62 }
 0x86f   :  { %v576_v20 = vpack.c.bf16 %v575_v19, %v574_v18  ;;  %v504_v26 = vmul.f32 %v1818_v24, %v1804_v52 }
 0x871   :  { %1627 = vmatmul.msk.bf16.vlgmr.msrb.gmra.mxu2 %vm154_vm8, %v576_v20  ;;  %v506_v27 = vpack.c.bf16 %v505_v25, %v504_v26 }
 0x87d   :  { %v509_v23 = vpop.permute.xlu1 %508 }
 0x87e   :  { %521 = vmatpush.bf16.msra.mxu1 %v509_v23 }
 0x881   :  { %1625 = vmatmul.msk.bf16.vlgmr.msra.gmra.mxu1 %vm154_vm8, %v506_v27 }
 0x882   :  { %637 = vmatpush.bf16.msrb.mxu1 %v1636_v33 }
 0x8f4   :  { %v592_v34 = vpop.f32.mrf.mxu2 }
 0x8fc   :  { %v594_v35 = vpop.f32.mrf.mxu2 }
 0x8fd   :  { %v597_v36 = vpack.c.bf16 %v594_v35, %v592_v34 }
 0x8fe   :  { %v523_v37 = vpop.f32.mrf.mxu1 }
 0x8ff   :  { %1632 = vmatmul.msk.bf16.vlgmr.msrb.gmra.mxu0 %vm154_vm8, %v597_v36 }
 0x906   :  { %v525_v38 = vpop.f32.mrf.mxu1 }
 0x907   :  { %v528_v39 = vpack.c.bf16 %v525_v38, %v523_v37 }
 0x909   :  { %1637 = vmatmul.msk.bf16.vlgmr.msrb.gmra.mxu1 %vm154_vm8, %v528_v39 }
 0x97c   :  { %v616_v40 = vpop.f32.mrf.mxu0 }
 0x984   :  { %v618_v50 = vpop.f32.mrf.mxu0 }
 0x986   :  { %v639_v43 = vpop.f32.mrf.mxu1 }
 0x987   :  { %v640_v45 = vadd.f32 %v639_v43, %v616_v40  ;;  %v1653_v40 = vld [vmem:[#allocation2 + $0x44] sm:$0xf]  ;;  %v1739_v43 = vld [vmem:[#allocation2 + $0x58] sm:$0xf0] }
 0x989   :  { %v648_v47 = vadd.f32 %v646_v44, %v640_v45 }
 0x98b   :  { %v2147_v48 = vadd.f32 %v648_v47, %v2065_v21  ;;  %v1649_v47 = vld [vmem:[#allocation2 + $0x14] sm:$0xf] }
 0x98d   :  { %v652_v49 = vsel %vm51_vm0, %v2147_v48, 0.0 }
 0x98e   :  { %v641_v52 = vpop.f32.mrf.mxu1  ;;  %653 = vadd.xlane.f32.xlu0 %v652_v49  ;;  %v1738_v49 = vld [vmem:[#allocation2 + $0x28] sm:$0xf0] }
 0x98f   :  { %v642_v53 = vadd.f32 %v641_v52, %v618_v50  ;;  %v1650_v50 = vor.u32 %v1738_v49, %v1649_v47  ;;  %v2203_v49 = vld [vmem:[%s2357_s5 + $0xd] ss:$0 sm:$0xff] }
 0x991   :  { %v649_v54 = vadd.f32 %v646_v44, %v642_v53  ;;  %v1654_v44 = vor.u32 %v1739_v43, %v1653_v40  ;;  %v767_v52 = vsel %vm762_vm6, %v1650_v50, 0  ;;  %v2198_v43 = vld [vmem:[%s2357_s5 + $0xc] ss:$0 sm:$0xff] }
 0x993   :  { %v2152_v55 = vadd.f32 %v649_v54, %v2071_v28  ;;  %v770_v45 = vsel %vm762_vm6, %v1654_v44, 0  ;;  %v1769_v54 = vld [vmem:[%s2357_s5 + $0x3] ss:$0 sm:$0xff] }
 0x994   :  { %778 = vmatpush.bf16.xpose.msra.mxu2 %v770_v45 }
 0x995   :  { %v655_v56 = vsel %vm51_vm0, %v2152_v55, 0.0 }
 0x996   :  { %656 = vadd.xlane.f32.xlu2 %v655_v56 }
 0x99c   :  { %779 = vmatpush.bf16.xpose.msra.mxu2 %v767_v52 }
 0x9ae   :  { %696 = vrot.lane.b32.xlu2 %v2000_v46, %s1930_s2  ;;  %v1644_v46 = vld [vmem:[#allocation2 + $0x40] sm:$0xf] }
 0x9af   :  { %v1645_v4 = vor.u32 %v1737_v3, %v1644_v46 }
 0x9b1   :  { %734 = vmatpush.bf16.msrb.mxu3 %v1645_v4 }
 0x9b5   :  { %735 = vmatpush.bf16.msrb.mxu3 %v1641_v12 }
 0xa01   :  { %v654_v21 = vpop.xlane.xlu0 %653 }
 0xa02   :  { %v658_v57 = vmul.f32 %v654_v21, %v1987_v10 }
 0xa04   :  { %v660_v58 = vsub.f32 %v2147_v48, %v658_v57 }
 0xa06   :  { %v662_v59 = vmul.f32 %v660_v58, %v660_v58 }
 0xa08   :  { %v664_v60 = vsel %vm51_vm0, %v662_v59, 0.0 }
 0xa09   :  { %v657_v61 = vpop.xlane.xlu2 %656  ;;  %665 = vadd.xlane.f32.xlu1 %v664_v60 }
 0xa0a   :  { %v659_v28 = vmul.f32 %v657_v61, %v1987_v10 }
 0xa0c   :  { %v661_v62 = vsub.f32 %v2152_v55, %v659_v28 }
 0xa0e   :  { %v663_v63 = vmul.f32 %v661_v62, %v661_v62 }
 0xa10   :  { %v667_v1 = vsel %vm51_vm0, %v663_v63, 0.0 }
 0xa11   :  { %668 = vadd.xlane.f32.xlu0 %v667_v1  ;;  %v697_v30 = vpop.permute.xlu2 %696 }
 0xa22   :  { %701 = vrot.lane.b32.xlu1 %v2006_v51, %s1930_s2 }
 0xa25   :  { %759 = vrot.lane.b32.xlu0 %v2061_v15, %s1930_s2 }
 0xa7c   :  { %v666_v6 = vpop.xlane.xlu1 %665 }
 0xa7d   :  { %v670_v7 = vmul.f32 %v666_v6, %v1987_v10 }
 0xa7f   :  { %v672_v13 = vadd.f32 1e-06, %v670_v7 }
 0xa81   :  { %1819 = vrsqrt.f32 %v672_v13  ;;  %vm680_vm1 = vweird.f32 %v672_v13 }
 0xa84   :  { %v669_v14 = vpop.xlane.xlu0 %668 }
 0xa85   :  { %v671_v16 = vmul.f32 %v669_v14, %v1987_v10 }
 0xa87   :  { %v1820_v51 = vpop.eup %1819  ;;  %v673_v17 = vadd.f32 1e-06, %v671_v16 }
 0xa88   :  { %v675_v18 = vmul.f32 %v1820_v51, %v672_v13  ;;  %vm681_vm15 = vweird.f32 %v1820_v51 }
 0xa89   :  { %1821 = vrsqrt.f32 %v673_v17  ;;  %vm682_vm2 = vmor %vm680_vm1, %vm681_vm15  ;;  %vm690_vm4 = vweird.f32 %v673_v17 }
 0xa8a   :  { %v676_v15 = vmul.f32 %v1820_v51, %v675_v18  ;;  %v1741_v18 = vld [vmem:[#allocation2 + $0xa4] sm:$0xf0] }
 0xa8c   :  { %v677_v19 = vmul.f32 0.5, %v676_v15 }
 0xa8e   :  { %v678_v20 = vsub.f32 1.5, %v677_v19 }
 0xa8f   :  { %v1822_v22 = vpop.eup %1821 }
 0xa90   :  { %v685_v24 = vmul.f32 %v1822_v22, %v673_v17  ;;  %v679_v25 = vmul.f32 %v1820_v51, %v678_v20  ;;  %vm691_vm3 = vweird.f32 %v1822_v22  ;;  %v1665_v17 = vld [vmem:[#allocation2 + $0x90] sm:$0xf] }
 0xa91   :  { %vm692_vm5 = vmor %vm690_vm4, %vm691_vm3  ;;  %v1666_v15 = vor.u32 %v1741_v18, %v1665_v17 }
 0xa92   :  { %v686_v26 = vmul.f32 %v1822_v22, %v685_v24  ;;  %v683_v27 = vsel %vm682_vm2, %v1820_v51, %v679_v25  ;;  %v1740_v24 = vld [vmem:[#allocation2 + $0x74] sm:$0xf0] }
 0xa93   :  { %v694_v0 = vmul.f32 %v683_v27, %v660_v58  ;;  %870 = vmatpush.bf16.msra.mxu0 %v1666_v15 }
 0xa94   :  { %v687_v23 = vmul.f32 0.5, %v686_v26  ;;  %v702_v35 = vpop.permute.xlu1 %701 }
 0xa95   :  { %v699_v34 = vmul.f32 %v697_v30, %v694_v0 }
 0xa96   :  { %v688_v29 = vsub.f32 1.5, %v687_v23 }
 0xa97   :  { %v704_v37 = vadd.f32 %v702_v35, %v699_v34  ;;  %v760_v61 = vpop.permute.xlu0 %759 }
 0xa98   :  { %v689_v31 = vmul.f32 %v1822_v22, %v688_v29 }
 0xa9a   :  { %v693_v32 = vsel %vm692_vm5, %v1822_v22, %v689_v31  ;;  %v1661_v22 = vld [vmem:[#allocation2 + $0x60] sm:$0xf] }
 0xa9b   :  { %v695_v33 = vmul.f32 %v693_v32, %v661_v62  ;;  %v1662_v25 = vor.u32 %v1740_v24, %v1661_v22 }
 0xa9d   :  { %v700_v36 = vmul.f32 %v697_v30, %v695_v33  ;;  %871 = vmatpush.bf16.msra.mxu0 %v1662_v25 }
 0xa9f   :  { %v705_v38 = vadd.f32 %v702_v35, %v700_v36 }
 0xaa1   :  { %v710_v39 = vpack.c.bf16 %v705_v38, %v704_v37 }
 0xaa3   :  { %1646 = vmatmul.msk.bf16.vlgmr.msrb.gmra.mxu3 %vm51_vm0, %v710_v39 }
 0xb26   :  { %v737_v53 = vpop.f32.mrf.mxu3 }
 0xb27   :  { %v738_v56 = vadd.f32 %v1769_v54, %v737_v53 }
 0xb29   :  { %v742_v58 = vmax.f32 %v738_v56, 0.0 }
 0xb2e   :  { %v739_v21 = vpop.f32.mrf.mxu3 }
 0xb2f   :  { %v740_v57 = vadd.f32 %v1769_v54, %v739_v21 }
 0xb31   :  { %v743_v59 = vmax.f32 %v740_v57, 0.0 }
 0xb33   :  { %v748_v60 = vpack.c.bf16 %v743_v59, %v742_v58  ;;  %v1772_v58 = vld [vmem:[%s2357_s5 + $0x8] ss:$0 sm:$0xff] }
 0xb35   :  { %1655 = vmatmul.msk.bf16.vlgmr.msra.gmra.mxu2 %vm762_vm6, %v748_v60 }
 0xbb8   :  { %v781_v28 = vpop.f32.mrf.mxu2 }
 0xbb9   :  { %v782_v62 = vadd.f32 %v781_v28, %v760_v61 }
 0xbbb   :  { %v2178_v63 = vadd.f32 %v782_v62, %v2147_v48 }
 0xbbd   :  { %v791_v1 = vsel %vm51_vm0, %v2178_v63, 0.0 }
 0xbbe   :  { %792 = vadd.xlane.f32.xlu2 %v791_v1 }
 0xbc0   :  { %v783_v46 = vpop.f32.mrf.mxu2 }
 0xbc1   :  { %v784_v3 = vadd.f32 %v783_v46, %v760_v61 }
 0xbc3   :  { %v2183_v4 = vadd.f32 %v784_v3, %v2152_v55 }
 0xbc5   :  { %v794_v6 = vsel %vm51_vm0, %v2183_v4, 0.0 }
 0xbc6   :  { %795 = vadd.xlane.f32.xlu0 %v794_v6 }
 0xc31   :  { %v793_v7 = vpop.xlane.xlu2 %792 }
 0xc32   :  { %v797_v8 = vmul.f32 %v793_v7, %v1987_v10 }
 0xc34   :  { %v799_v11 = vsub.f32 %v2178_v63, %v797_v8 }
 0xc36   :  { %v801_v48 = vmul.f32 %v799_v11, %v799_v11 }
 0xc38   :  { %v803_v12 = vsel %vm51_vm0, %v801_v48, 0.0 }
 0xc39   :  { %v796_v13 = vpop.xlane.xlu0 %795  ;;  %804 = vadd.xlane.f32.xlu1 %v803_v12 }
 0xc3a   :  { %v798_v14 = vmul.f32 %v796_v13, %v1987_v10 }
 0xc3c   :  { %v800_v16 = vsub.f32 %v2183_v4, %v798_v14 }
 0xc3e   :  { %v802_v55 = vmul.f32 %v800_v16, %v800_v16 }
 0xc40   :  { %v806_v51 = vsel %vm51_vm0, %v802_v55, 0.0 }
 0xc41   :  { %807 = vadd.xlane.f32.xlu2 %v806_v51 }
 0xcac   :  { %v805_v19 = vpop.xlane.xlu1 %804 }
 0xcad   :  { %v809_v20 = vmul.f32 %v805_v19, %v1987_v10 }
 0xcaf   :  { %v811_v26 = vadd.f32 1e-06, %v809_v20 }
 0xcb1   :  { %1823 = vrsqrt.f32 %v811_v26  ;;  %vm819_vm9 = vweird.f32 %v811_v26 }
 0xcb4   :  { %v808_v23 = vpop.xlane.xlu2 %807 }
 0xcb5   :  { %v810_v27 = vmul.f32 %v808_v23, %v1987_v10 }
 0xcb7   :  { %v1824_v29 = vpop.eup %1823  ;;  %v812_v0 = vadd.f32 1e-06, %v810_v27 }
 0xcb8   :  { %v814_v30 = vmul.f32 %v1824_v29, %v811_v26  ;;  %vm820_vm7 = vweird.f32 %v1824_v29 }
 0xcb9   :  { %1825 = vrsqrt.f32 %v812_v0  ;;  %vm821_vm10 = vmor %vm819_vm9, %vm820_vm7  ;;  %vm829_vm12 = vweird.f32 %v812_v0 }
 0xcba   :  { %v815_v31 = vmul.f32 %v1824_v29, %v814_v30 }
 0xcbc   :  { %v816_v32 = vmul.f32 0.5, %v815_v31 }
 0xcbe   :  { %v817_v33 = vsub.f32 1.5, %v816_v32 }
 0xcbf   :  { %v1826_v34 = vpop.eup %1825 }
 0xcc0   :  { %v818_v35 = vmul.f32 %v1824_v29, %v817_v33  ;;  %v824_v36 = vmul.f32 %v1826_v34, %v812_v0  ;;  %vm830_vm11 = vweird.f32 %v1826_v34 }
 0xcc1   :  { %vm831_vm13 = vmor %vm829_vm12, %vm830_vm11 }
 0xcc2   :  { %v825_v37 = vmul.f32 %v1826_v34, %v824_v36  ;;  %v822_v38 = vsel %vm821_vm10, %v1824_v29, %v818_v35 }
 0xcc3   :  { %v833_v44 = vmul.f32 %v822_v38, %v799_v11 }
 0xcc4   :  { %v826_v39 = vmul.f32 0.5, %v825_v37 }
 0xcc5   :  { %v836_v50 = vmul.f32 %v2198_v43, %v833_v44 }
 0xcc6   :  { %v827_v40 = vsub.f32 1.5, %v826_v39 }
 0xcc7   :  { %v839_v54 = vadd.f32 %v2203_v49, %v836_v50 }
 0xcc8   :  { %v828_v45 = vmul.f32 %v1826_v34, %v827_v40 }
 0xcca   :  { %v832_v47 = vsel %vm831_vm13, %v1826_v34, %v828_v45 }
 0xccb   :  { %v834_v52 = vmul.f32 %v832_v47, %v800_v16 }
 0xccd   :  { %v837_v53 = vmul.f32 %v2198_v43, %v834_v52 }
 0xccf   :  { %v840_v56 = vadd.f32 %v2203_v49, %v837_v53 }
 0xcd1   :  { %v846_v21 = vpack.c.bf16 %v840_v56, %v839_v54 }
 0xcd3   :  { %1667 = vmatmul.msk.bf16.vlgmr.msra.gmra.mxu0 %vm51_vm0, %v846_v21 }
 0xd50   :  { %v873_v57 = vpop.f32.mrf.mxu0 }
 0xd51   :  { %v874_v60 = vadd.f32 %v1772_v58, %v873_v57 }
 0xd58   :  { %v875_v59 = vpop.f32.mrf.mxu0 }
 0xd59   :  { %v876_v61 = vadd.f32 %v1772_v58, %v875_v59 }
 0xd5b   :  { %v883_v28 = vpack.c.bf16 %v876_v61, %v874_v60  ;;  %v1680_v60 = vld [vmem:[#allocation2 + $0x68] sm:$0xf]  ;;  %v1742_v61 = vld [vmem:[#allocation2 + $0x7c] sm:$0xf0] }
 0xd5d   :  { %951 = vrot.lane.b32.xlu2 %v883_v28, %s1927_s12  ;;  %953 = vrot.lane.b32.xlu1 %v883_v28, %s1929_s14 }
 0xd5e   :  { %885 = vrot.lane.b32.xlu0 %v883_v28, %s1928_s13 }
 0xdb7   :  { %v952_v6 = vpop.permute.xlu2 %951 }
 0xdcf   :  { %v954_v62 = vpop.permute.xlu1 %953 }
 0xdd0   :  { %v959_v1 = vsel %vm154_vm8, %v954_v62, 0  ;;  %v886_v46 = vpop.permute.xlu0 %885  ;;  %v1675_v62 = vld [vmem:[#allocation2 + $0x98] sm:$0xf] }
 0xdd1   :  { %v891_v3 = vsel %vm154_vm8, %v886_v46, 0  ;;  %968 = vmatpush.bf16.xpose.msrb.mxu2 %v959_v1  ;;  %v1743_v1 = vld [vmem:[#allocation2 + $0xac] sm:$0xf0] }
 0xdd2   :  { %900 = vmatpush.bf16.xpose.msra.mxu1 %v891_v3  ;;  %v1676_v46 = vor.u32 %v1743_v1, %v1675_v62 }
 0xdd8   :  { %1671 = vmatmul.msk.bf16.vlgmr.msrb.gmra.mxu2 %vm154_vm8, %v952_v6 }
 0xdd9   :  { %1669 = vmatmul.msk.bf16.vlgmr.msra.gmra.mxu1 %vm154_vm8, %v883_v28 }
 0xdda   :  { %1035 = vmatpush.bf16.msrb.mxu1 %v1676_v46 }
 0xe56   :  { %v902_v7 = vpop.f32.mrf.mxu1 }
 0xe57   :  { %v903_v8 = vadd.f32 %v902_v7, %v2031_v5 }
 0xe59   :  { %v907_v11 = vsel %vm154_vm8, %v903_v8, -inf }
 0xe5a   :  { %908 = vmax.xlane.f32.xlu0 %v907_v11 }
 0xe5b   :  { %v970_v48 = vpop.f32.mrf.mxu2 }
 0xe5c   :  { %v971_v12 = vadd.f32 %v970_v48, %v2031_v5 }
 0xe5e   :  { %v904_v13 = vpop.f32.mrf.mxu1  ;;  %v975_v14 = vsel %vm154_vm8, %v971_v12, -inf }
 0xe5f   :  { %v905_v16 = vadd.f32 %v904_v13, %v2038_v9  ;;  %976 = vmax.xlane.f32.xlu2 %v975_v14  ;;  %v2241_v13 = vld [vmem:[%s2357_s5 + $0xa] ss:$0 sm:$0xff] }
 0xe61   :  { %v910_v55 = vsel %vm154_vm8, %v905_v16, -inf }
 0xe62   :  { %911 = vmax.xlane.f32.xlu1 %v910_v55 }
 0xe63   :  { %v972_v51 = vpop.f32.mrf.mxu2 }
 0xe64   :  { %v973_v17 = vadd.f32 %v972_v51, %v2038_v9 }
 0xe66   :  { %v978_v18 = vsel %vm154_vm8, %v973_v17, -inf }
 0xe67   :  { %979 = vmax.xlane.f32.xlu0 %v978_v18 }
 0xe7b   :  { %930 = vrot.lane.b32.xlu0 %v883_v28, %s1930_s2 }
 0xecd   :  { %v909_v15 = vpop.xlane.xlu0 %908 }
 0xece   :  { %v913_v19 = vsub.f32 %v903_v8, %v909_v15 }
 0xed0   :  { %v915_v5 = vmul.f32 1.442695, %v913_v19 }
 0xed2   :  { %1827 = vpow2.f32 %v915_v5  ;;  %v977_v20 = vpop.xlane.xlu2 %976 }
 0xed3   :  { %v981_v22 = vsub.f32 %v971_v12, %v977_v20 }
 0xed5   :  { %v983_v24 = vmul.f32 1.442695, %v981_v22  ;;  %v912_v25 = vpop.xlane.xlu1 %911 }
 0xed6   :  { %v914_v26 = vsub.f32 %v905_v16, %v912_v25  ;;  %v1745_v25 = vld [vmem:[#allocation2 + $0xa8] sm:$0xf0] }
 0xed7   :  { %1829 = vpow2.f32 %v983_v24  ;;  %v1690_v24 = vld [vmem:[#allocation2 + $0x94] sm:$0xf] }
 0xed8   :  { %v1828_v23 = vpop.eup %1827  ;;  %v917_v27 = vmul.f32 1.442695, %v914_v26  ;;  %v1686_v26 = vld [vmem:[#allocation2 + $0x64] sm:$0xf] }
 0xed9   :  { %v919_v29 = vsel %vm154_vm8, %v1828_v23, 0.0 }
 0xeda   :  { %1831 = vpow2.f32 %v917_v27  ;;  %920 = vadd.xlane.f32.xlu1 %v919_v29  ;;  %v980_v9 = vpop.xlane.xlu0 %979 }
 0xedb   :  { %v982_v0 = vsub.f32 %v973_v17, %v980_v9 }
 0xedd   :  { %v985_v30 = vmul.f32 1.442695, %v982_v0  ;;  %v1830_v31 = vpop.eup %1829 }
 0xede   :  { %v987_v34 = vsel %vm154_vm8, %v1830_v31, 0.0 }
 0xedf   :  { %1833 = vpow2.f32 %v985_v30 }
 0xee0   :  { %v1832_v32 = vpop.eup %1831 }
 0xee1   :  { %v922_v33 = vsel %vm154_vm8, %v1832_v32, 0.0 }
 0xee2   :  { %923 = vadd.xlane.f32.xlu2 %v922_v33  ;;  %988 = vadd.xlane.f32.xlu1 %v987_v34 }
 0xee5   :  { %v1834_v35 = vpop.eup %1833 }
 0xee6   :  { %v990_v36 = vsel %vm154_vm8, %v1834_v35, 0.0 }
 0xeea   :  { %991 = vadd.xlane.f32.xlu2 %v990_v36 }
 0xeed   :  { %v931_v37 = vpop.permute.xlu0 %930 }
 0xeee   :  { %943 = vmatpush.bf16.msra.mxu3 %v931_v37 }
 0xefb   :  { %998 = vrot.lane.b32.xlu1 %v883_v28, %s1931_s19  ;;  %v1681_v28 = vor.u32 %v1742_v61, %v1680_v60 }
 0xefd   :  { %1058 = vmatpush.bf16.msrb.mxu3 %v1681_v28 }
 0xf4d   :  { %v921_v38 = vpop.xlane.xlu1 %920 }
 0xf4e   :  { %1835 = vrcp.f32 %v921_v38  ;;  %v1774_v38 = vld [vmem:[%s2357_s5 + $0x9] ss:$0 sm:$0xff] }
 0xf54   :  { %v1836_v40 = vpop.eup %1835 }
 0xf55   :  { %v924_v39 = vpop.xlane.xlu2 %923  ;;  %v927_v45 = vmul.f32 %v1836_v40, %v1828_v23  ;;  %v989_v53 = vpop.xlane.xlu1 %988  ;;  %v1744_v23 = vld [vmem:[#allocation2 + $0x78] sm:$0xf0] }
 0xf56   :  { %1837 = vrcp.f32 %v924_v39  ;;  %v1687_v27 = vor.u32 %v1744_v23, %v1686_v26 }
 0xf5c   :  { %v1838_v44 = vpop.eup %1837 }
 0xf5d   :  { %v928_v47 = vmul.f32 %v1838_v44, %v1832_v32  ;;  %v992_v52 = vpop.xlane.xlu2 %991 }
 0xf5e   :  { %1839 = vrcp.f32 %v992_v52 }
 0xf5f   :  { %v929_v50 = vpack.c.bf16 %v928_v47, %v927_v45  ;;  %1841 = vrcp.f32 %v989_v53 }
 0xf61   :  { %1670 = vmatmul.msk.bf16.vlgmr.msra.gmra.mxu3 %vm154_vm8, %v929_v50 }
 0xf64   :  { %v1840_v54 = vpop.eup %1839 }
 0xf65   :  { %v1842_v56 = vpop.eup %1841  ;;  %v996_v21 = vmul.f32 %v1840_v54, %v1834_v35 }
 0xf66   :  { %v995_v57 = vmul.f32 %v1842_v56, %v1830_v31 }
 0xf68   :  { %v997_v59 = vpack.c.bf16 %v996_v21, %v995_v57 }
 0xf6d   :  { %v999_v58 = vpop.permute.xlu1 %998 }
 0xf6e   :  { %1011 = vmatpush.bf16.msrb.mxu0 %v999_v58 }
 0xf71   :  { %1672 = vmatmul.msk.bf16.vlgmr.msrb.gmra.mxu0 %vm154_vm8, %v997_v59 }
 0xfe4   :  { %v945_v3 = vpop.f32.mrf.mxu3 }
 0xfec   :  { %v947_v6 = vpop.f32.mrf.mxu3 }
 0xfed   :  { %v950_v7 = vpack.c.bf16 %v947_v6, %v945_v3 }
 0xfee   :  { %v1013_v8 = vpop.f32.mrf.mxu0 }
 0xfef   :  { %1682 = vmatmul.msk.bf16.vlgmr.msrb.gmra.mxu3 %vm154_vm8, %v950_v7 }
 0xff6   :  { %v1015_v11 = vpop.f32.mrf.mxu0 }
 0xff7   :  { %v1018_v48 = vpack.c.bf16 %v1015_v11, %v1013_v8 }
 0xff9   :  { %1677 = vmatmul.msk.bf16.vlgmr.msrb.gmra.mxu1 %vm154_vm8, %v1018_v48 }
0x1072   :  { %v1060_v12 = vpop.f32.mrf.mxu3 }
0x1076   :  { %v1037_v14 = vpop.f32.mrf.mxu1 }
0x1077   :  { %v1061_v16 = vadd.f32 %v1060_v12, %v1037_v14 }
0x1079   :  { %v1066_v55 = vadd.f32 %v2241_v13, %v1061_v16 }
0x107a   :  { %v1062_v18 = vpop.f32.mrf.mxu3 }
0x107b   :  { %v2245_v51 = vadd.f32 %v1066_v55, %v2178_v63  ;;  %v1691_v63 = vor.u32 %v1745_v25, %v1690_v24 }
0x107d   :  { %v1070_v17 = vsel %vm51_vm0, %v2245_v51, 0.0  ;;  %1164 = vrot.lane.b32.xlu1 %v1691_v63, %s1928_s13  ;;  %1154 = vmatpush.bf16.msra.mxu2 %v1691_v63 }
0x107e   :  { %v1039_v15 = vpop.f32.mrf.mxu1  ;;  %1071 = vadd.xlane.f32.xlu2 %v1070_v17 }
0x107f   :  { %v1063_v19 = vadd.f32 %v1062_v18, %v1039_v15 }
0x1081   :  { %v1067_v5 = vadd.f32 %v2241_v13, %v1063_v19  ;;  %1155 = vmatpush.bf16.msra.mxu2 %v1687_v27 }
0x1083   :  { %v2251_v20 = vadd.f32 %v1067_v5, %v2183_v4 }
0x1085   :  { %v1073_v22 = vsel %vm51_vm0, %v2251_v20, 0.0  ;;  %1162 = vrot.lane.b32.xlu1 %v1687_v27, %s1928_s13 }
0x1086   :  { %1074 = vadd.xlane.f32.xlu0 %v1073_v22 }
0x108d   :  { %1121 = vrot.lane.b32.xlu1 %v2203_v49, %s1928_s13 }
0x109a   :  { %1169 = vrot.lane.b32.xlu0 %v1774_v38, %s1928_s13 }
0x10ef   :  { %v1165_v36 = vpop.permute.xlu1 %1164 }
0x10f0   :  { %1178 = vmatpush.bf16.msra.mxu0 %v1165_v36 }
0x10f1   :  { %v1072_v4 = vpop.xlane.xlu2 %1071 }
0x10f2   :  { %v1076_v29 = vmul.f32 %v1072_v4, %v1987_v10 }
0x10f4   :  { %v1078_v9 = vsub.f32 %v2245_v51, %v1076_v29 }
0x10f6   :  { %v1080_v0 = vmul.f32 %v1078_v9, %v1078_v9 }
0x10f7   :  { %v1163_v37 = vpop.permute.xlu1 %1162 }
0x10f8   :  { %v1082_v30 = vsel %vm51_vm0, %v1080_v0, 0.0  ;;  %1179 = vmatpush.bf16.msra.mxu0 %v1163_v37 }
0x10f9   :  { %v1075_v31 = vpop.xlane.xlu0 %1074  ;;  %1083 = vadd.xlane.f32.xlu2 %v1082_v30 }
0x10fa   :  { %v1077_v32 = vmul.f32 %v1075_v31, %v1987_v10 }
0x10fb   :  { %1693 = vmatmul.msk.bf16.vlgmr.msra.gmra.mxu0 %vm51_vm0, %v2093_v42 }
0x10fc   :  { %v1079_v33 = vsub.f32 %v2251_v20, %v1077_v32 }
0x10fe   :  { %v1081_v34 = vmul.f32 %v1079_v33, %v1079_v33 }
0x10ff   :  { %v1122_v8 = vpop.permute.xlu1 %1121 }
0x1100   :  { %v1085_v35 = vsel %vm51_vm0, %v1081_v34, 0.0 }
0x1101   :  { %1086 = vadd.xlane.f32.xlu2 %v1085_v35 }
0x110c   :  { %v1170_v17 = vpop.permute.xlu0 %1169 }
0x1119   :  { %1115 = vrot.lane.b32.xlu2 %v2198_v43, %s1928_s13 }
0x116c   :  { %v1084_v39 = vpop.xlane.xlu2 %1083 }
0x116d   :  { %v1088_v40 = vmul.f32 %v1084_v39, %v1987_v10 }
0x116f   :  { %v1090_v44 = vadd.f32 1e-06, %v1088_v40 }
0x1171   :  { %1843 = vrsqrt.f32 %v1090_v44  ;;  %vm1098_vm15 = vweird.f32 %v1090_v44 }
0x1174   :  { %v1087_v45 = vpop.xlane.xlu2 %1086 }
0x1175   :  { %v1089_v47 = vmul.f32 %v1087_v45, %v1987_v10 }
0x1177   :  { %v1844_v50 = vpop.eup %1843  ;;  %v1091_v52 = vadd.f32 1e-06, %v1089_v47 }
0x1178   :  { %v1093_v53 = vmul.f32 %v1844_v50, %v1090_v44  ;;  %vm1099_vm14 = vweird.f32 %v1844_v50  ;;  %v1181_v16 = vpop.f32.mrf.mxu0 }
0x1179   :  { %1845 = vrsqrt.f32 %v1091_v52  ;;  %vm1100_vm1 = vmor %vm1098_vm15, %vm1099_vm14  ;;  %vm1108_vm3 = vweird.f32 %v1091_v52  ;;  %v1182_v18 = vadd.f32 %v1181_v16, %v1170_v17 }
0x117a   :  { %v1094_v54 = vmul.f32 %v1844_v50, %v1093_v53 }
0x117c   :  { %v1095_v42 = vmul.f32 0.5, %v1094_v54  ;;  %v1116_v46 = vpop.permute.xlu2 %1115 }
0x117e   :  { %v1096_v56 = vsub.f32 1.5, %v1095_v42 }
0x117f   :  { %v1846_v21 = vpop.eup %1845 }
0x1180   :  { %v1103_v57 = vmul.f32 %v1846_v21, %v1091_v52  ;;  %v1097_v58 = vmul.f32 %v1844_v50, %v1096_v56  ;;  %vm1109_vm2 = vweird.f32 %v1846_v21  ;;  %v1183_v55 = vpop.f32.mrf.mxu0 }
0x1181   :  { %vm1110_vm4 = vmor %vm1108_vm3, %vm1109_vm2  ;;  %v1184_v15 = vadd.f32 %v1183_v55, %v1170_v17 }
0x1182   :  { %v1104_v59 = vmul.f32 %v1846_v21, %v1103_v57  ;;  %v1101_v61 = vsel %vm1100_vm1, %v1844_v50, %v1097_v58 }
0x1183   :  { %v1112_v62 = vmul.f32 %v1101_v61, %v1078_v9  ;;  %v1191_v19 = vpack.c.bf16 %v1184_v15, %v1182_v18 }
0x1184   :  { %v1105_v60 = vmul.f32 0.5, %v1104_v59 }
0x1185   :  { %v1118_v7 = vmul.f32 %v1116_v46, %v1112_v62  ;;  %1260 = vrot.lane.b32.xlu1 %v1191_v19, %s1927_s12  ;;  %v1196_v5 = vsel %vm154_vm8, %v1191_v19, 0 }
0x1186   :  { %v1106_v28 = vsub.f32 1.5, %v1105_v60  ;;  %1205 = vmatpush.bf16.xpose.msra.mxu1 %v1196_v5  ;;  %v1746_v5 = vld [vmem:[#allocation2 + $0x80] sm:$0xf0] }
0x1187   :  { %v1124_v48 = vadd.f32 %v1122_v8, %v1118_v7 }
0x1188   :  { %v1107_v1 = vmul.f32 %v1846_v21, %v1106_v28 }
0x118a   :  { %v1111_v3 = vsel %vm1110_vm4, %v1846_v21, %v1107_v1 }
0x118b   :  { %v1113_v6 = vmul.f32 %v1111_v3, %v1079_v33 }
0x118d   :  { %v1119_v11 = vmul.f32 %v1116_v46, %v1113_v6 }
0x118f   :  { %v1125_v12 = vadd.f32 %v1122_v8, %v1119_v11 }
0x1191   :  { %v1131_v14 = vpack.c.bf16 %v1125_v12, %v1124_v48 }
0x1193   :  { %1692 = vmatmul.msk.bf16.vlgmr.msra.gmra.mxu2 %vm51_vm0, %v1131_v14 }
0x11f7   :  { %v1261_v23 = vpop.permute.xlu1 %1260 }
0x11f8   :  { %v1266_v27 = vsel %vm154_vm8, %v1261_v23, 0  ;;  %v1747_v23 = vld [vmem:[#allocation2 + $0xb0] sm:$0xf0] }
0x11f9   :  { %1275 = vmatpush.bf16.xpose.msrb.mxu2 %v1266_v27 }
0x1216   :  { %v1157_v22 = vpop.f32.mrf.mxu2 }
0x1217   :  { %v1158_v25 = vadd.f32 %v1774_v38, %v1157_v22 }
0x121e   :  { %v1159_v24 = vpop.f32.mrf.mxu2 }
0x121f   :  { %v1160_v63 = vadd.f32 %v1774_v38, %v1159_v24 }
0x1221   :  { %v1190_v26 = vpack.c.bf16 %v1160_v63, %v1158_v25 }
0x1223   :  { %1258 = vrot.lane.b32.xlu2 %v1190_v26, %s1927_s12  ;;  %1694 = vmatmul.msk.bf16.vlgmr.msra.gmra.mxu1 %vm154_vm8, %v1190_v26  ;;  %v1700_v26 = vld [vmem:[#allocation2 + $0x9c] sm:$0xf] }
0x1224   :  { %v1701_v27 = vor.u32 %v1747_v23, %v1700_v26  ;;  %v1724_v23 = vld [vmem:[#allocation2 + $0xa4] sm:$0xf] }
0x1226   :  { %1342 = vmatpush.bf16.msrb.mxu1 %v1701_v27  ;;  %v1751_v27 = vld [vmem:[#allocation2 + $0xb8] sm:$0xf0] }
0x127d   :  { %v1259_v4 = vpop.permute.xlu2 %1258 }
0x127e   :  { %1696 = vmatmul.msk.bf16.vlgmr.msrb.gmra.mxu2 %vm154_vm8, %v1259_v4 }
0x12a0   :  { %v1207_v29 = vpop.f32.mrf.mxu1 }
0x12a1   :  { %v1208_v9 = vadd.f32 %v1207_v29, %v2117_v2 }
0x12a3   :  { %v1212_v0 = vsel %vm154_vm8, %v1208_v9, -inf }
0x12a4   :  { %1213 = vmax.xlane.f32.xlu1 %v1212_v0 }
0x12a8   :  { %v1209_v30 = vpop.f32.mrf.mxu1 }
0x12a9   :  { %v1210_v31 = vadd.f32 %v1209_v30, %v2128_v41 }
0x12ab   :  { %v1215_v32 = vsel %vm154_vm8, %v1210_v31, -inf }
0x12ac   :  { %1216 = vmax.xlane.f32.xlu2 %v1215_v32 }
0x1301   :  { %v1277_v33 = vpop.f32.mrf.mxu2 }
0x1302   :  { %v1278_v34 = vadd.f32 %v1277_v33, %v2117_v2 }
0x1304   :  { %v1282_v35 = vsel %vm154_vm8, %v1278_v34, -inf }
0x1305   :  { %1283 = vmax.xlane.f32.xlu0 %v1282_v35 }
0x1309   :  { %v1279_v36 = vpop.f32.mrf.mxu2 }
0x130a   :  { %v1280_v37 = vadd.f32 %v1279_v36, %v2128_v41 }
0x130c   :  { %v1285_v38 = vsel %vm154_vm8, %v1280_v37, -inf }
0x130d   :  { %1286 = vmax.xlane.f32.xlu2 %v1285_v38 }
0x1317   :  { %v1214_v39 = vpop.xlane.xlu1 %1213 }
0x1318   :  { %v1218_v40 = vsub.f32 %v1208_v9, %v1214_v39 }
0x131a   :  { %v1220_v44 = vmul.f32 1.442695, %v1218_v40 }
0x131c   :  { %1847 = vpow2.f32 %v1220_v44 }
0x131f   :  { %v1217_v45 = vpop.xlane.xlu2 %1216 }
0x1320   :  { %v1219_v47 = vsub.f32 %v1210_v31, %v1217_v45 }
0x1322   :  { %v1848_v50 = vpop.eup %1847  ;;  %v1222_v52 = vmul.f32 1.442695, %v1219_v47 }
0x1323   :  { %v1224_v53 = vsel %vm154_vm8, %v1848_v50, 0.0 }
0x1324   :  { %1849 = vpow2.f32 %v1222_v52  ;;  %1225 = vadd.xlane.f32.xlu1 %v1224_v53 }
0x132a   :  { %v1850_v2 = vpop.eup %1849 }
0x132b   :  { %v1227_v54 = vsel %vm154_vm8, %v1850_v2, 0.0 }
0x132c   :  { %1228 = vadd.xlane.f32.xlu2 %v1227_v54 }
0x133d   :  { %1236 = vrot.lane.b32.xlu1 %v1191_v19, %s1928_s13 }
0x1378   :  { %v1284_v41 = vpop.xlane.xlu0 %1283 }
0x1379   :  { %v1288_v42 = vsub.f32 %v1278_v34, %v1284_v41 }
0x137b   :  { %v1290_v56 = vmul.f32 1.442695, %v1288_v42  ;;  %v1749_v42 = vld [vmem:[#allocation2 + $0xb4] sm:$0xf0] }
0x137d   :  { %1851 = vpow2.f32 %v1290_v56 }
0x1380   :  { %v1287_v21 = vpop.xlane.xlu2 %1286 }
0x1381   :  { %v1289_v57 = vsub.f32 %v1280_v37, %v1287_v21 }
0x1383   :  { %v1852_v58 = vpop.eup %1851  ;;  %v1292_v59 = vmul.f32 1.442695, %v1289_v57 }
0x1384   :  { %v1294_v60 = vsel %vm154_vm8, %v1852_v58, 0.0 }
0x1385   :  { %1853 = vpow2.f32 %v1292_v59  ;;  %1295 = vadd.xlane.f32.xlu0 %v1294_v60  ;;  %v1748_v59 = vld [vmem:[#allocation2 + $0x84] sm:$0xf0] }
0x138b   :  { %v1854_v61 = vpop.eup %1853 }
0x138c   :  { %v1297_v28 = vsel %vm154_vm8, %v1854_v61, 0.0 }
0x138d   :  { %1298 = vadd.xlane.f32.xlu2 %v1297_v28 }
0x1397   :  { %v1226_v1 = vpop.xlane.xlu1 %1225 }
0x1399   :  { %1305 = vrot.lane.b32.xlu0 %v1191_v19, %s1929_s14  ;;  %v1705_v19 = vld [vmem:[#allocation2 + $0x6c] sm:$0xf] }
0x139a   :  { %v1706_v22 = vor.u32 %v1746_v5, %v1705_v19 }
0x139f   :  { %v1229_v62 = vpop.xlane.xlu2 %1228 }
0x13a0   :  { %1855 = vrcp.f32 %v1229_v62 }
0x13a1   :  { %1857 = vrcp.f32 %v1226_v1 }
0x13a5   :  { %1373 = vrot.lane.b32.xlu2 %v2241_v13, %s1928_s13 }
0x13a6   :  { %v1856_v46 = vpop.eup %1855 }
0x13a7   :  { %v1858_v3 = vpop.eup %1857  ;;  %v1233_v6 = vmul.f32 %v1856_v46, %v1850_v2 }
0x13a8   :  { %v1232_v7 = vmul.f32 %v1858_v3, %v1848_v50 }
0x13aa   :  { %v1234_v11 = vpack.c.bf16 %v1233_v6, %v1232_v7 }
0x13af   :  { %v1237_v8 = vpop.permute.xlu1 %1236 }
0x13b0   :  { %1249 = vmatpush.bf16.msra.mxu3 %v1237_v8 }
0x13b3   :  { %1695 = vmatmul.msk.bf16.vlgmr.msra.gmra.mxu3 %vm154_vm8, %v1234_v11 }
0x13b4   :  { %1365 = vmatpush.bf16.msrb.mxu3 %v1706_v22 }
0x13f8   :  { %v1296_v48 = vpop.xlane.xlu0 %1295 }
0x1400   :  { %v1299_v12 = vpop.xlane.xlu2 %1298 }
0x1401   :  { %1859 = vrcp.f32 %v1299_v12 }
0x1402   :  { %1861 = vrcp.f32 %v1296_v48 }
0x1407   :  { %v1860_v14 = vpop.eup %1859 }
0x1408   :  { %v1862_v16 = vpop.eup %1861  ;;  %v1303_v55 = vmul.f32 %v1860_v14, %v1854_v61  ;;  %v1374_v31 = vpop.permute.xlu2 %1373 }
0x1409   :  { %v1302_v17 = vmul.f32 %v1862_v16, %v1852_v58  ;;  %v1711_v58 = vld [vmem:[#allocation2 + $0x70] sm:$0xf] }
0x140a   :  { %v1712_v61 = vor.u32 %v1748_v59, %v1711_v58 }
0x140b   :  { %v1306_v18 = vpop.permute.xlu0 %1305  ;;  %v1304_v15 = vpack.c.bf16 %v1303_v55, %v1302_v17 }
0x140c   :  { %1318 = vmatpush.bf16.msrb.mxu0 %v1306_v18 }
0x140f   :  { %1697 = vmatmul.msk.bf16.vlgmr.msrb.gmra.mxu0 %vm154_vm8, %v1304_v15 }
0x1436   :  { %v1251_v24 = vpop.f32.mrf.mxu3 }
0x143e   :  { %v1253_v25 = vpop.f32.mrf.mxu3 }
0x143f   :  { %v1256_v63 = vpack.c.bf16 %v1253_v25, %v1251_v24 }
0x1441   :  { %1707 = vmatmul.msk.bf16.vlgmr.msrb.gmra.mxu3 %vm154_vm8, %v1256_v63 }
0x148c   :  { %v1320_v4 = vpop.f32.mrf.mxu0 }
0x1494   :  { %v1322_v29 = vpop.f32.mrf.mxu0 }
0x1495   :  { %v1325_v9 = vpack.c.bf16 %v1322_v29, %v1320_v4  ;;  %v1725_v4 = vor.u32 %v1751_v27, %v1724_v23 }
0x1497   :  { %1702 = vmatmul.msk.bf16.vlgmr.msrb.gmra.mxu1 %vm154_vm8, %v1325_v9  ;;  %v1497_v29 = vsel %vm762_vm6, %v1725_v4, 0  ;;  %v1720_v9 = vld [vmem:[#allocation2 + $0x74] sm:$0xf] }
0x1498   :  { %1505 = vmatpush.bf16.xpose.msra.mxu0 %v1497_v29 }
0x14c4   :  { %v1367_v0 = vpop.f32.mrf.mxu3 }
0x14cc   :  { %v1369_v36 = vpop.f32.mrf.mxu3 }
0x1514   :  { %v1344_v30 = vpop.f32.mrf.mxu1 }
0x1515   :  { %v1368_v32 = vadd.f32 %v1367_v0, %v1344_v30  ;;  %v1750_v0 = vld [vmem:[#allocation2 + $0x88] sm:$0xf0] }
0x1516   :  { %v1721_v30 = vor.u32 %v1750_v0, %v1720_v9 }
0x1517   :  { %v1376_v33 = vadd.f32 %v1374_v31, %v1368_v32 }
0x1519   :  { %v2303_v34 = vadd.f32 %v1376_v33, %v2245_v51  ;;  %v1775_v33 = vld [vmem:[%s2357_s5 + $0xb] ss:$0 sm:$0xff] }
0x151b   :  { %v1380_v35 = vsel %vm51_vm0, %v2303_v34, 0.0 }
0x151c   :  { %v1346_v37 = vpop.f32.mrf.mxu1  ;;  %1381 = vadd.xlane.f32.xlu1 %v1380_v35 }
0x151d   :  { %v1370_v38 = vadd.f32 %v1369_v36, %v1346_v37 }
0x151f   :  { %v1377_v39 = vadd.f32 %v1374_v31, %v1370_v38  ;;  %v1494_v31 = vsel %vm762_vm6, %v1721_v30, 0 }
0x1520   :  { %1506 = vmatpush.bf16.xpose.msra.mxu0 %v1494_v31 }
0x1521   :  { %v2308_v40 = vadd.f32 %v1377_v39, %v2251_v20 }
0x1523   :  { %v1383_v44 = vsel %vm51_vm0, %v2308_v40, 0.0 }
0x1524   :  { %1384 = vadd.xlane.f32.xlu0 %v1383_v44 }
0x1538   :  { %1424 = vrot.lane.b32.xlu0 %v2198_v43, %s1930_s2  ;;  %v1715_v43 = vld [vmem:[#allocation2 + $0xa0] sm:$0xf] }
0x1539   :  { %v1716_v56 = vor.u32 %v1749_v42, %v1715_v43 }
0x153b   :  { %1462 = vmatpush.bf16.msra.mxu2 %v1716_v56 }
0x153f   :  { %1463 = vmatpush.bf16.msra.mxu2 %v1712_v61 }
0x158f   :  { %v1382_v51 = vpop.xlane.xlu1 %1381 }
0x1590   :  { %v1386_v45 = vmul.f32 %v1382_v51, %v1987_v10 }
0x1592   :  { %v1388_v47 = vsub.f32 %v2303_v34, %v1386_v45 }
0x1594   :  { %v1390_v50 = vmul.f32 %v1388_v47, %v1388_v47 }
0x1596   :  { %v1392_v52 = vsel %vm51_vm0, %v1390_v50, 0.0 }
0x1597   :  { %v1385_v53 = vpop.xlane.xlu0 %1384  ;;  %1393 = vadd.xlane.f32.xlu2 %v1392_v52 }
0x1598   :  { %v1387_v20 = vmul.f32 %v1385_v53, %v1987_v10 }
0x159a   :  { %v1389_v2 = vsub.f32 %v2308_v40, %v1387_v20 }
0x159c   :  { %v1391_v54 = vmul.f32 %v1389_v2, %v1389_v2 }
0x159e   :  { %v1395_v41 = vsel %vm51_vm0, %v1391_v54, 0.0 }
0x159f   :  { %1396 = vadd.xlane.f32.xlu1 %v1395_v41  ;;  %v1776_v41 = vld [vmem:[%s2357_s5 + $0x10] ss:$0 sm:$0xff]  ;;  %s1932_s5 = smov [#allocation5]  }
0x15aa   :  { %v1425_v18 = vpop.permute.xlu0 %1424 }
0x15af   :  { %1487 = vrot.lane.b32.xlu2 %v2241_v13, %s1930_s2 }
0x15b8   :  { %1429 = vrot.lane.b32.xlu1 %v2203_v49, %s1930_s2 }
0x160a   :  { %v1394_v21 = vpop.xlane.xlu2 %1393 }
0x160b   :  { %v1398_v57 = vmul.f32 %v1394_v21, %v1987_v10 }
0x160d   :  { %v1400_v60 = vadd.f32 1e-06, %v1398_v57 }
0x160f   :  { %1863 = vrsqrt.f32 %v1400_v60  ;;  %vm1408_vm5 = vweird.f32 %v1400_v60 }
0x1612   :  { %v1397_v28 = vpop.xlane.xlu1 %1396  ;;  %v1488_v51 = vpop.permute.xlu2 %1487 }
0x1613   :  { %v1399_v62 = vmul.f32 %v1397_v28, %v1987_v10 }
0x1615   :  { %v1864_v13 = vpop.eup %1863  ;;  %v1401_v1 = vadd.f32 1e-06, %v1399_v62 }
0x1616   :  { %v1403_v46 = vmul.f32 %v1864_v13, %v1400_v60  ;;  %vm1409_vm8 = vweird.f32 %v1864_v13 }
0x1617   :  { %1865 = vrsqrt.f32 %v1401_v1  ;;  %vm1410_vm7 = vmor %vm1408_vm5, %vm1409_vm8  ;;  %vm1418_vm10 = vweird.f32 %v1401_v1 }
0x1618   :  { %v1404_v49 = vmul.f32 %v1864_v13, %v1403_v46 }
0x161a   :  { %v1405_v3 = vmul.f32 0.5, %v1404_v49 }
0x161c   :  { %v1406_v6 = vsub.f32 1.5, %v1405_v3 }
0x161d   :  { %v1866_v7 = vpop.eup %1865 }
0x161e   :  { %v1413_v8 = vmul.f32 %v1866_v7, %v1401_v1  ;;  %v1407_v48 = vmul.f32 %v1864_v13, %v1406_v6  ;;  %vm1419_vm9 = vweird.f32 %v1866_v7 }
0x161f   :  { %vm1420_vm11 = vmor %vm1418_vm10, %vm1419_vm9 }
0x1620   :  { %v1414_v11 = vmul.f32 %v1866_v7, %v1413_v8  ;;  %v1411_v16 = vsel %vm1410_vm7, %v1864_v13, %v1407_v48 }
0x1621   :  { %v1422_v17 = vmul.f32 %v1411_v16, %v1388_v47 }
0x1622   :  { %v1415_v12 = vmul.f32 0.5, %v1414_v11 }
0x1623   :  { %v1427_v22 = vmul.f32 %v1425_v18, %v1422_v17 }
0x1624   :  { %v1416_v14 = vsub.f32 1.5, %v1415_v12 }
0x1626   :  { %v1417_v55 = vmul.f32 %v1866_v7, %v1416_v14 }
0x1628   :  { %v1421_v15 = vsel %vm1420_vm11, %v1866_v7, %v1417_v55 }
0x1629   :  { %v1423_v19 = vmul.f32 %v1421_v15, %v1389_v2 }
0x162a   :  { %v1430_v5 = vpop.permute.xlu1 %1429 }
0x162b   :  { %v1428_v24 = vmul.f32 %v1425_v18, %v1423_v19  ;;  %v1432_v25 = vadd.f32 %v1430_v5, %v1427_v22 }
0x162d   :  { %v1433_v63 = vadd.f32 %v1430_v5, %v1428_v24 }
0x162f   :  { %v1438_v26 = vpack.c.bf16 %v1433_v63, %v1432_v25 }
0x1631   :  { %1717 = vmatmul.msk.bf16.vlgmr.msra.gmra.mxu2 %vm51_vm0, %v1438_v26 }
0x16b4   :  { %v1465_v32 = vpop.f32.mrf.mxu2 }
0x16b5   :  { %v1466_v35 = vadd.f32 %v1775_v33, %v1465_v32 }
0x16b7   :  { %v1470_v38 = vmax.f32 %v1466_v35, 0.0 }
0x16bc   :  { %v1467_v36 = vpop.f32.mrf.mxu2 }
0x16bd   :  { %v1468_v37 = vadd.f32 %v1775_v33, %v1467_v36 }
0x16bf   :  { %v1471_v39 = vmax.f32 %v1468_v37, 0.0 }
0x16c1   :  { %v1476_v44 = vpack.c.bf16 %v1471_v39, %v1470_v38 }
0x16c3   :  { %1726 = vmatmul.msk.bf16.vlgmr.msra.gmra.mxu0 %vm762_vm6, %v1476_v44 }
0x1740   :  { %v1508_v45 = vpop.f32.mrf.mxu0 }
0x1741   :  { %v1509_v47 = vadd.f32 %v1508_v45, %v1488_v51 }
0x1743   :  { %v1513_v50 = vadd.f32 %v1509_v47, %v2303_v34 }
0x1745   :  { %v1517_v52 = vsel %vm51_vm0, %v1513_v50, 0.0 }
0x1746   :  { %1518 = vadd.xlane.f32.xlu0 %v1517_v52 }
0x1748   :  { %v1510_v53 = vpop.f32.mrf.mxu0 }
0x1749   :  { %v1511_v20 = vadd.f32 %v1510_v53, %v1488_v51 }
0x174b   :  { %v1514_v2 = vadd.f32 %v1511_v20, %v2308_v40 }
0x174d   :  { %v1520_v54 = vsel %vm51_vm0, %v1514_v2, 0.0 }
0x174e   :  { %1521 = vadd.xlane.f32.xlu1 %v1520_v54 }
0x1767   :  { %1565 = vrot.lane.b32.xlu1 %v1776_v41, %s1928_s13  ;;  %s1576_s13 = sshll.u32 %s1932_s5, 4  ;;  %s1577_s13 = int_to_ptr.vmem [resolvable:$true] %s1576_s13 }
0x17b9   :  { %v1519_v43 = vpop.xlane.xlu0 %1518 }
0x17ba   :  { %v1523_v42 = vmul.f32 %v1519_v43, %v1987_v10 }
0x17bc   :  { %v1525_v34 = vsub.f32 %v1513_v50, %v1523_v42 }
0x17be   :  { %v1527_v56 = vmul.f32 %v1525_v34, %v1525_v34 }
0x17c0   :  { %v1529_v21 = vsel %vm51_vm0, %v1527_v56, 0.0 }
0x17c1   :  { %v1522_v57 = vpop.xlane.xlu1 %1521  ;;  %1530 = vadd.xlane.f32.xlu2 %v1529_v21 }
0x17c2   :  { %v1524_v40 = vmul.f32 %v1522_v57, %v1987_v10 }
0x17c4   :  { %v1526_v58 = vsub.f32 %v1514_v2, %v1524_v40 }
0x17c6   :  { %v1528_v59 = vmul.f32 %v1526_v58, %v1526_v58 }
0x17c8   :  { %v1532_v60 = vsel %vm51_vm0, %v1528_v59, 0.0 }
0x17c9   :  { %1533 = vadd.xlane.f32.xlu0 %v1532_v60 }
0x17d9   :  { %v1566_v18 = vpop.permute.xlu1 %1565 }
0x1834   :  { %v1531_v61 = vpop.xlane.xlu2 %1530 }
0x1835   :  { %v1535_v28 = vmul.f32 %v1531_v61, %v1987_v10 }
0x1837   :  { %v1537_v62 = vadd.f32 1e-06, %v1535_v28 }
0x1839   :  { %1867 = vrsqrt.f32 %v1537_v62  ;;  %vm1545_vm12 = vweird.f32 %v1537_v62 }
0x183c   :  { %v1534_v13 = vpop.xlane.xlu0 %1533 }
0x183d   :  { %v1536_v1 = vmul.f32 %v1534_v13, %v1987_v10 }
0x183f   :  { %v1868_v46 = vpop.eup %1867  ;;  %v1538_v49 = vadd.f32 1e-06, %v1536_v1 }
0x1840   :  { %v1540_v3 = vmul.f32 %v1868_v46, %v1537_v62  ;;  %vm1546_vm6 = vweird.f32 %v1868_v46 }
0x1841   :  { %1869 = vrsqrt.f32 %v1538_v49  ;;  %vm1547_vm13 = vmor %vm1545_vm12, %vm1546_vm6  ;;  %vm1555_vm15 = vweird.f32 %v1538_v49 }
0x1842   :  { %v1541_v6 = vmul.f32 %v1868_v46, %v1540_v3 }
0x1844   :  { %v1542_v7 = vmul.f32 0.5, %v1541_v6 }
0x1846   :  { %v1543_v8 = vsub.f32 1.5, %v1542_v7 }
0x1847   :  { %v1870_v11 = vpop.eup %1869 }
0x1848   :  { %v1550_v48 = vmul.f32 %v1870_v11, %v1538_v49  ;;  %v1544_v12 = vmul.f32 %v1868_v46, %v1543_v8  ;;  %vm1556_vm14 = vweird.f32 %v1870_v11 }
0x1849   :  { %vm1557_vm1 = vmor %vm1555_vm15, %vm1556_vm14 }
0x184a   :  { %v1551_v14 = vmul.f32 %v1870_v11, %v1550_v48  ;;  %v1548_v16 = vsel %vm1547_vm13, %v1868_v46, %v1544_v12 }
0x184b   :  { %v1559_v55 = vmul.f32 %v1548_v16, %v1525_v34 }
0x184c   :  { %v1552_v17 = vmul.f32 0.5, %v1551_v14 }
0x184d   :  { %v1562_v15 = vmul.f32 %v1776_v41, %v1559_v55 }
0x184e   :  { %v1553_v10 = vsub.f32 1.5, %v1552_v17 }
0x184f   :  { %v1568_v19 = vadd.f32 %v1566_v18, %v1562_v15 }
0x1850   :  { %v1554_v5 = vmul.f32 %v1870_v11, %v1553_v10 }
0x1851   :  { %1570 = vst.msk [vmem:[#allocation5] sm:$0xff] %vm51_vm0, %v1568_v19 }
0x1852   :  { %v1558_v22 = vsel %vm1557_vm1, %v1870_v11, %v1554_v5 }
0x1853   :  { %v1560_v24 = vmul.f32 %v1558_v22, %v1526_v58 }
0x1855   :  { %v1563_v25 = vmul.f32 %v1776_v41, %v1560_v24 }
0x1857   :  { %v1569_v63 = vadd.f32 %v1566_v18, %v1563_v25 }
0x1859   :  { %1571 = vst.msk [vmem:[#allocation5 + $0x8] sm:$0xff] %vm51_vm0, %v1569_v63 }
0x185a   :  { %1584 = dma.vmem_to_hbm [thread:$0]  %s1577_s13, 256, %s1579_s22, [#allocation4], %s1933_s23, %s1933_s23, %s1934_s24  }
0x185b   :  { %1921 = dma.done.wait [#allocation4], 256  }
0x185c   :  { %1922 = vsyncadd [#allocation4], 4294967040 }
0x185d   :  { %1589 = vsyncpa [#allocation3], 1 }
0x185e   :  { %1590 = vsyncpa [#allocation4], 1 }

</bundles_post_ra>
